<compile_context>
chip_gen: v7x
topology: tpu7x:2x2x1
jax: 0.10.0
libtpu: 0.0.40
codegen_flags: <defaults>
</compile_context>

<pallas_src>
import math

import jax
import jax.numpy as jnp
from jax.experimental import pallas as pl
from jax.experimental.pallas import tpu as pltpu


# --------------------------------------------------------------------------
# helpers
# --------------------------------------------------------------------------
def _logaddexp(a, b):
    m = jnp.maximum(a, b)
    return m + jnp.log(jnp.exp(a - m) + jnp.exp(b - m))


# --------------------------------------------------------------------------
# fused kernel
# --------------------------------------------------------------------------
def _make_fused_kernel(meta, beta):
    """Build the fused per-image kernel.

    meta: list of per-block dicts with keys H, W, Cin, Ccls, K, Cout
          (K/Cout are None for the final Identity-conv block).
    Weight refs per block (in order):
      wskip_blk (W*Cin, W*Ccls) bf16   block-diagonal 1x1 skip conv
      bskip_t   (1, W*Ccls)     f32    skip bias tiled over W
      gmat      (W*Ccls, Ccls)  f32    class-gather (sums the W lane groups)
      [conv blocks only]
      wconv_blk (K, W*Cin, Wo*2Cout) bf16  per-ky block-diagonal conv weights
                                            with CReLU folded in ([W, -W])
      bconv_t   (1, Wo*2Cout)   f32    folded conv bias tiled over Wo
    """

    def kernel(*refs):
        x_ref = refs[0]
        out_ref = refs[-1]
        wrefs = refs[1:-1]

        ccls = meta[0]["Ccls"]
        x = x_ref[0]                                   # (H0, W0*Cin0) f32
        y_max = jnp.zeros((1, ccls), jnp.float32)      # torch: -zeros(1) == 0
        y_min = jnp.zeros((1, ccls), jnp.float32)

        wi = 0
        for m in meta:
            H, W, Cin, Ccls = m["H"], m["W"], m["Cin"], m["Ccls"]
            wskip = wrefs[wi][...]                     # (W*Cin, W*Ccls) bf16
            bskip = wrefs[wi + 1][...]                 # (1, W*Ccls)     f32
            gmat = wrefs[wi + 2][...]                  # (W*Ccls, Ccls)  f32
            wi += 3

            xb = x.astype(jnp.bfloat16)

            # ---- skip 1x1 conv (block-diagonal matmul, lane-dense) ----
            ysk = jnp.dot(xb, wskip,
                          preferred_element_type=jnp.float32) + bskip  # (H, W*Ccls)
            z = beta * ysk

            # beta-logsumexp over all H*W spatial positions, per class.
            # Global (scalar) max is used for stability; the per-class sums
            # are recovered exactly via the class-gather matmul.
            mpos = jnp.max(jnp.max(z, axis=1, keepdims=True),
                           axis=0, keepdims=True)                      # (1,1)
            mneg = jnp.max(jnp.max(-z, axis=1, keepdims=True),
                           axis=0, keepdims=True)                      # (1,1)
            epos = jnp.exp(z - mpos)                                   # (H, W*Ccls)
            eneg = jnp.exp(-z - mneg)                                  # (H, W*Ccls)

            # Reduce the H rows first (cheap sublane adds), then ONE small
            # class-gather matmul handles both the +beta and -beta branches.
            rows = jnp.concatenate(
                [jnp.sum(epos, axis=0, keepdims=True),
                 jnp.sum(eneg, axis=0, keepdims=True)], axis=0)        # (2, W*Ccls)
            s2 = jnp.dot(rows, gmat,
                         preferred_element_type=jnp.float32)           # (2, Ccls)
            lmax = mpos + jnp.log(s2[0:1, :])                          # (1, Ccls)
            lmin = mneg + jnp.log(s2[1:2, :])                          # (1, Ccls)

            y_max = _logaddexp(y_max, lmax)
            y_min = _logaddexp(y_min, lmin)

            # ---- main KxK valid conv + Fold (CReLU folded into weights) ----
            if m["K"] is not None:
                K, Cout2 = m["K"], 2 * m["Cout"]
                Ho, Wo = H - K + 1, W - K + 1
                wconv_ref = wrefs[wi]                  # (K, W*Cin, Wo*Cout2) bf16
                bconv = wrefs[wi + 1][...]             # (1, Wo*Cout2) f32
                wi += 2

                acc = jnp.zeros((Ho, Wo * Cout2), jnp.float32) + bconv
                for ky in range(K):                    # K row-shifted matmuls
                    acc = acc + jnp.dot(xb[ky:ky + Ho, :], wconv_ref[ky],
                                        preferred_element_type=jnp.float32)
                # relu of [out, -out] == CReLU(out); channels doubled in W2.
                x = jnp.maximum(acc, 0.0)              # next block's (Ho, Wo*Cin')

        out_ref[0] = (y_max + y_min) * (1.0 / beta)    # torch: -(-ymin/b - ymax/b)

    return kernel


# --------------------------------------------------------------------------
# host-side weight preprocessing (one time)
# --------------------------------------------------------------------------
def _prepare_kernel_weights(params, H0, W0, Cin0):
    Ccls = params["classnum"]
    meta, weights = [], []
    H, W, Cin = H0, W0, Cin0
    for blk in params["blocks"]:
        K, Cout = blk["K"], blk["Cout"]
        meta.append(dict(H=H, W=W, Cin=Cin, Ccls=Ccls, K=K, Cout=Cout))

        # 1x1 skip conv as a block-diagonal matmul over the (W*Cin) lane axis.
        wskip_blk = jnp.kron(jnp.eye(W, dtype=jnp.float32),
                             blk["wskip"]).astype(jnp.bfloat16)        # (W*Cin, W*Ccls)
        bskip_t = jnp.tile(blk["bskip"], (1, W)).astype(jnp.float32)    # (1, W*Ccls)
        gmat = jnp.tile(jnp.eye(Ccls, dtype=jnp.float32), (W, 1))       # (W*Ccls, Ccls)
        weights += [wskip_blk, bskip_t, gmat]

        if K is not None:
            Ho, Wo = H - K + 1, W - K + 1
            Cout2 = 2 * Cout
            w4 = blk["wconv"]                                           # (K, K, Cin, Cout)
            w4f = jnp.concatenate([w4, -w4], axis=-1)                   # fold CReLU
            taps = []
            for ky in range(K):
                wky = jnp.zeros((W * Cin, Wo * Cout2), jnp.float32)
                for kx in range(K):
                    blkmat = jnp.kron(jnp.eye(Wo, dtype=jnp.float32), w4f[ky, kx])
                    wky = wky.at[kx * Cin:kx * Cin + Wo * Cin, :].add(blkmat)
                taps.append(wky)
            wconv_blk = jnp.stack(taps, axis=0).astype(jnp.bfloat16)    # (K, W*Cin, Wo*2Cout)
            b2 = jnp.concatenate([blk["bconv"], -blk["bconv"]], axis=-1)
            bconv_t = jnp.tile(b2, (1, Wo)).astype(jnp.float32)          # (1, Wo*2Cout)
            weights += [wconv_blk, bconv_t]
            H, W, Cin = Ho, Wo, Cout2
    return meta, weights


# --------------------------------------------------------------------------
# parameter init (mirrors BottleNet.__init__ shapes)
# --------------------------------------------------------------------------
def init_params(key, layers=4, classnum=10, num_filter=4, filter_scale=1, init_coef=1.0):
    num_filter = math.ceil(num_filter * filter_scale)
    filternums = (layers - 1) * (num_filter,) + (classnum,)
    k_sh_list = 14 * [3] + 10 * [1]
    blocks = []
    in_channel = 3
    for i in range(layers):
        k = k_sh_list[i]
        filternum = filternums[i]
        key, k1, k2, k3, k4 = jax.random.split(key, 5)
        # skipconv_i: Conv2d(in_channel, classnum, 1x1) -> weight (Cin, classnum)
        wskip = jax.random.normal(k1, (in_channel, classnum), jnp.float32) * 0.1 * init_coef
        bskip = jax.random.normal(k2, (1, classnum), jnp.float32) * 0.1
        if i == layers - 1:
            wconv = bconv = None
            K = Cout = None
        else:
            # conv_i: Conv2d(in_channel, filternum, KxK, pad=0), stored HWIO.
            K, Cout = k, filternum
            wconv = (jax.random.normal(k3, (K, K, in_channel, Cout), jnp.float32)
                     * 0.1 * init_coef)
            bconv = jax.random.normal(k4, (1, Cout), jnp.float32) * 0.1
        blocks.append(dict(wskip=wskip, bskip=bskip, wconv=wconv, bconv=bconv,
                           K=K, Cout=Cout))
        in_channel = num_filter * 2
    return dict(blocks=blocks, classnum=classnum)


# --------------------------------------------------------------------------
# forward builder: one fused pallas_call
# --------------------------------------------------------------------------
def build_forward(params, input_hw, beta=2.0):
    H0, W0 = input_hw
    Cin0 = params["blocks"][0]["wskip"].shape[0]
    Ccls = params["classnum"]

    meta, weights = _prepare_kernel_weights(params, H0, W0, Cin0)
    kernel = _make_fused_kernel(meta, float(beta))

    def forward(x_nchw):
        N = x_nchw.shape[0]
        # NCHW (torch) -> lane-dense row-image layout (N, H, W*Cin).
        x2d = jnp.transpose(x_nchw.astype(jnp.float32),
                            (0, 2, 3, 1)).reshape(N, H0, W0 * Cin0)

        in_specs = [pl.BlockSpec((1, H0, W0 * Cin0), lambda n: (n, 0, 0))]
        for w in weights:
            # Weights are small and use a constant block index, so they stay
            # resident in VMEM across all grid steps (no re-DMA).
            in_specs.append(
                pl.BlockSpec(w.shape, (lambda n, _r=w.ndim: (0,) * _r)))

        out = pl.pallas_call(
            kernel,
            out_shape=jax.ShapeDtypeStruct((N, 1, Ccls), jnp.float32),
            grid=(N,),
            in_specs=in_specs,
            out_specs=pl.BlockSpec((1, 1, Ccls), lambda n: (n, 0, 0)),
            compiler_params=pltpu.CompilerParams(
                dimension_semantics=("parallel",)),   # v7x: batch across the 2 TCs
        )(x2d, *weights)
        return out[:, 0, :]

    return jax.jit(forward)


if __name__ == "__main__":
    key = jax.random.PRNGKey(0)
    kx, kp = jax.random.split(key)
    # Small shapes consistent with the module: batch=2, 3 input channels, 16x16,
    # layers=4, classnum=10, num_filter=4.
    x = jax.random.normal(kx, (2, 3, 16, 16), jnp.float32)   # NCHW as in torch
    params = init_params(kp, layers=4, classnum=10, num_filter=4,
                         filter_scale=1, init_coef=1.0)
    fwd = build_forward(params, (16, 16), beta=2.0)
    out = jax.block_until_ready(fwd(x))
    assert out.shape == (2, 10), out.shape
    assert bool(jnp.all(jnp.isfinite(out)))
    print("KERNEL_OK")
</pallas_src>

<mosaic_0001>
module attributes {stable_mosaic.version = 11 : i64} {
  func.func @kernel(%arg0: i32, %arg1: memref<1x16x48xf32, #tpu.memory_space<vmem>>, %arg2: memref<48x160xbf16, #tpu.memory_space<vmem>>, %arg3: memref<1x160xf32, #tpu.memory_space<vmem>>, %arg4: memref<160x10xf32, #tpu.memory_space<vmem>>, %arg5: memref<3x48x112xbf16, #tpu.memory_space<vmem>>, %arg6: memref<1x112xf32, #tpu.memory_space<vmem>>, %arg7: memref<112x140xbf16, #tpu.memory_space<vmem>>, %arg8: memref<1x140xf32, #tpu.memory_space<vmem>>, %arg9: memref<140x10xf32, #tpu.memory_space<vmem>>, %arg10: memref<3x112x96xbf16, #tpu.memory_space<vmem>>, %arg11: memref<1x96xf32, #tpu.memory_space<vmem>>, %arg12: memref<96x120xbf16, #tpu.memory_space<vmem>>, %arg13: memref<1x120xf32, #tpu.memory_space<vmem>>, %arg14: memref<120x10xf32, #tpu.memory_space<vmem>>, %arg15: memref<3x96x80xbf16, #tpu.memory_space<vmem>>, %arg16: memref<1x80xf32, #tpu.memory_space<vmem>>, %arg17: memref<80x100xbf16, #tpu.memory_space<vmem>>, %arg18: memref<1x100xf32, #tpu.memory_space<vmem>>, %arg19: memref<100x10xf32, #tpu.memory_space<vmem>>, %arg20: memref<1x1x10xf32, #tpu.memory_space<vmem>>) attributes {dimension_semantics = [#tpu.dimension_semantics<parallel>], iteration_bounds = array<i64: 2>, scalar_prefetch = 0 : i64, scratch_operands = 0 : i64, tpu.core_type = #tpu.core_type<tc>, window_params = [{transform_indices = @transform_0, window_bounds = array<i64: 1, 16, 48>}, {pipeline_mode = #tpu.pipeline_mode<synchronous>, transform_indices = @transform_1, window_bounds = array<i64: 48, 160>}, {pipeline_mode = #tpu.pipeline_mode<synchronous>, transform_indices = @transform_2, window_bounds = array<i64: 1, 160>}, {pipeline_mode = #tpu.pipeline_mode<synchronous>, transform_indices = @transform_3, window_bounds = array<i64: 160, 10>}, {pipeline_mode = #tpu.pipeline_mode<synchronous>, transform_indices = @transform_4, window_bounds = array<i64: 3, 48, 112>}, {pipeline_mode = #tpu.pipeline_mode<synchronous>, transform_indices = @transform_5, window_bounds = array<i64: 1, 112>}, {pipeline_mode = #tpu.pipeline_mode<synchronous>, transform_indices = @transform_6, window_bounds = array<i64: 112, 140>}, {pipeline_mode = #tpu.pipeline_mode<synchronous>, transform_indices = @transform_7, window_bounds = array<i64: 1, 140>}, {pipeline_mode = #tpu.pipeline_mode<synchronous>, transform_indices = @transform_8, window_bounds = array<i64: 140, 10>}, {pipeline_mode = #tpu.pipeline_mode<synchronous>, transform_indices = @transform_9, window_bounds = array<i64: 3, 112, 96>}, {pipeline_mode = #tpu.pipeline_mode<synchronous>, transform_indices = @transform_10, window_bounds = array<i64: 1, 96>}, {pipeline_mode = #tpu.pipeline_mode<synchronous>, transform_indices = @transform_11, window_bounds = array<i64: 96, 120>}, {pipeline_mode = #tpu.pipeline_mode<synchronous>, transform_indices = @transform_12, window_bounds = array<i64: 1, 120>}, {pipeline_mode = #tpu.pipeline_mode<synchronous>, transform_indices = @transform_13, window_bounds = array<i64: 120, 10>}, {pipeline_mode = #tpu.pipeline_mode<synchronous>, transform_indices = @transform_14, window_bounds = array<i64: 3, 96, 80>}, {pipeline_mode = #tpu.pipeline_mode<synchronous>, transform_indices = @transform_15, window_bounds = array<i64: 1, 80>}, {pipeline_mode = #tpu.pipeline_mode<synchronous>, transform_indices = @transform_16, window_bounds = array<i64: 80, 100>}, {pipeline_mode = #tpu.pipeline_mode<synchronous>, transform_indices = @transform_17, window_bounds = array<i64: 1, 100>}, {pipeline_mode = #tpu.pipeline_mode<synchronous>, transform_indices = @transform_18, window_bounds = array<i64: 100, 10>}, {transform_indices = @transform_19, window_bounds = array<i64: 1, 1, 10>}]} {
    %c0 = arith.constant 0 : index
    %c0_0 = arith.constant 0 : index
    %c0_1 = arith.constant 0 : index
    %0 = vector.load %arg1[%c0, %c0_0, %c0_1] : memref<1x16x48xf32, #tpu.memory_space<vmem>>, vector<1x16x48xf32>
    %1 = vector.shape_cast %0 : vector<1x16x48xf32> to vector<16x48xf32>
    %cst = arith.constant 0.000000e+00 : f32
    %2 = vector.broadcast %cst : f32 to vector<1x10xf32>
    %cst_2 = arith.constant 0.000000e+00 : f32
    %3 = vector.broadcast %cst_2 : f32 to vector<1x10xf32>
    %c0_3 = arith.constant 0 : index
    %c0_4 = arith.constant 0 : index
    %4 = vector.load %arg2[%c0_3, %c0_4] : memref<48x160xbf16, #tpu.memory_space<vmem>>, vector<48x160xbf16>
    %c0_5 = arith.constant 0 : index
    %c0_6 = arith.constant 0 : index
    %5 = vector.load %arg3[%c0_5, %c0_6] : memref<1x160xf32, #tpu.memory_space<vmem>>, vector<1x160xf32>
    %c0_7 = arith.constant 0 : index
    %c0_8 = arith.constant 0 : index
    %6 = vector.load %arg4[%c0_7, %c0_8] : memref<160x10xf32, #tpu.memory_space<vmem>>, vector<160x10xf32>
    %7 = arith.truncf %1 : vector<16x48xf32> to vector<16x48xbf16>
    %cst_9 = arith.constant dense<0.000000e+00> : vector<16x160xf32>
    %8 = tpu.matmul %7, %4, %cst_9 {dimension_numbers = #tpu.dot_dimension_numbers<[1], [0], [0], [1], [0, 0, 1, 1], [], []>} : vector<16x48xbf16>, vector<48x160xbf16>, vector<16x160xf32> -> vector<16x160xf32>
    %9 = vector.broadcast %5 : vector<1x160xf32> to vector<16x160xf32>
    %10 = arith.addf %8, %9 : vector<16x160xf32>
    %cst_10 = arith.constant 2.000000e+00 : f32
    %11 = vector.broadcast %cst_10 : f32 to vector<16x160xf32>
    %12 = arith.mulf %11, %10 : vector<16x160xf32>
    %cst_11 = arith.constant dense<0xFF800000> : vector<16xf32>
    %13 = vector.multi_reduction <maximumf>, %12, %cst_11 [1] : vector<16x160xf32> to vector<16xf32>
    %14 = vector.shape_cast %13 : vector<16xf32> to vector<16x1xf32>
    %cst_12 = arith.constant dense<0xFF800000> : vector<1xf32>
    %15 = vector.multi_reduction <maximumf>, %14, %cst_12 [0] : vector<16x1xf32> to vector<1xf32>
    %16 = vector.shape_cast %15 : vector<1xf32> to vector<1x1xf32>
    %cst_13 = arith.constant 0.000000e+00 : f32
    %17 = vector.broadcast %cst_13 : f32 to vector<16x160xf32>
    %18 = arith.subf %17, %12 : vector<16x160xf32>
    %cst_14 = arith.constant dense<0xFF800000> : vector<16xf32>
    %19 = vector.multi_reduction <maximumf>, %18, %cst_14 [1] : vector<16x160xf32> to vector<16xf32>
    %20 = vector.shape_cast %19 : vector<16xf32> to vector<16x1xf32>
    %cst_15 = arith.constant dense<0xFF800000> : vector<1xf32>
    %21 = vector.multi_reduction <maximumf>, %20, %cst_15 [0] : vector<16x1xf32> to vector<1xf32>
    %22 = vector.shape_cast %21 : vector<1xf32> to vector<1x1xf32>
    %23 = vector.broadcast %16 : vector<1x1xf32> to vector<16x160xf32>
    %24 = arith.subf %12, %23 : vector<16x160xf32>
    %25 = math.exp %24 : vector<16x160xf32>
    %cst_16 = arith.constant 0.000000e+00 : f32
    %26 = vector.broadcast %cst_16 : f32 to vector<16x160xf32>
    %27 = arith.subf %26, %12 : vector<16x160xf32>
    %28 = vector.broadcast %22 : vector<1x1xf32> to vector<16x160xf32>
    %29 = arith.subf %27, %28 : vector<16x160xf32>
    %30 = math.exp %29 : vector<16x160xf32>
    %cst_17 = arith.constant dense<0.000000e+00> : vector<160xf32>
    %31 = vector.multi_reduction <add>, %25, %cst_17 [0] : vector<16x160xf32> to vector<160xf32>
    %32 = vector.shape_cast %31 : vector<160xf32> to vector<1x160xf32>
    %cst_18 = arith.constant dense<0.000000e+00> : vector<160xf32>
    %33 = vector.multi_reduction <add>, %30, %cst_18 [0] : vector<16x160xf32> to vector<160xf32>
    %34 = vector.shape_cast %33 : vector<160xf32> to vector<1x160xf32>
    %35 = tpu.concatenate %32, %34 in 0 : vector<1x160xf32>, vector<1x160xf32> -> vector<2x160xf32>
    %cst_19 = arith.constant dense<0.000000e+00> : vector<2x10xf32>
    %36 = tpu.matmul %35, %6, %cst_19 {dimension_numbers = #tpu.dot_dimension_numbers<[1], [0], [0], [1], [0, 0, 1, 1], [], []>} : vector<2x160xf32>, vector<160x10xf32>, vector<2x10xf32> -> vector<2x10xf32>
    %37 = vector.extract_strided_slice %36 {offsets = [0, 0], sizes = [1, 10], strides = [1, 1]} : vector<2x10xf32> to vector<1x10xf32>
    %38 = math.log %37 : vector<1x10xf32>
    %39 = vector.broadcast %16 : vector<1x1xf32> to vector<1x10xf32>
    %40 = arith.addf %39, %38 : vector<1x10xf32>
    %41 = vector.extract_strided_slice %36 {offsets = [1, 0], sizes = [1, 10], strides = [1, 1]} : vector<2x10xf32> to vector<1x10xf32>
    %42 = math.log %41 : vector<1x10xf32>
    %43 = vector.broadcast %22 : vector<1x1xf32> to vector<1x10xf32>
    %44 = arith.addf %43, %42 : vector<1x10xf32>
    %45 = arith.maximumf %2, %40 : vector<1x10xf32>
    %46 = arith.subf %2, %45 : vector<1x10xf32>
    %47 = math.exp %46 : vector<1x10xf32>
    %48 = arith.subf %40, %45 : vector<1x10xf32>
    %49 = math.exp %48 : vector<1x10xf32>
    %50 = arith.addf %47, %49 : vector<1x10xf32>
    %51 = math.log %50 : vector<1x10xf32>
    %52 = arith.addf %45, %51 : vector<1x10xf32>
    %53 = arith.maximumf %3, %44 : vector<1x10xf32>
    %54 = arith.subf %3, %53 : vector<1x10xf32>
    %55 = math.exp %54 : vector<1x10xf32>
    %56 = arith.subf %44, %53 : vector<1x10xf32>
    %57 = math.exp %56 : vector<1x10xf32>
    %58 = arith.addf %55, %57 : vector<1x10xf32>
    %59 = math.log %58 : vector<1x10xf32>
    %60 = arith.addf %53, %59 : vector<1x10xf32>
    %c0_20 = arith.constant 0 : index
    %c0_21 = arith.constant 0 : index
    %61 = vector.load %arg6[%c0_20, %c0_21] : memref<1x112xf32, #tpu.memory_space<vmem>>, vector<1x112xf32>
    %cst_22 = arith.constant 0.000000e+00 : f32
    %62 = vector.broadcast %cst_22 : f32 to vector<14x112xf32>
    %63 = vector.broadcast %61 : vector<1x112xf32> to vector<14x112xf32>
    %64 = arith.addf %62, %63 : vector<14x112xf32>
    %65 = vector.extract_strided_slice %7 {offsets = [0, 0], sizes = [14, 48], strides = [1, 1]} : vector<16x48xbf16> to vector<14x48xbf16>
    %c0_23 = arith.constant 0 : index
    %c0_24 = arith.constant 0 : index
    %c0_25 = arith.constant 0 : index
    %66 = vector.load %arg5[%c0_23, %c0_24, %c0_25] : memref<3x48x112xbf16, #tpu.memory_space<vmem>>, vector<1x48x112xbf16>
    %67 = vector.shape_cast %66 : vector<1x48x112xbf16> to vector<48x112xbf16>
    %cst_26 = arith.constant dense<0.000000e+00> : vector<14x112xf32>
    %68 = tpu.matmul %65, %67, %cst_26 {dimension_numbers = #tpu.dot_dimension_numbers<[1], [0], [0], [1], [0, 0, 1, 1], [], []>} : vector<14x48xbf16>, vector<48x112xbf16>, vector<14x112xf32> -> vector<14x112xf32>
    %69 = arith.addf %64, %68 : vector<14x112xf32>
    %70 = vector.extract_strided_slice %7 {offsets = [1, 0], sizes = [14, 48], strides = [1, 1]} : vector<16x48xbf16> to vector<14x48xbf16>
    %c1 = arith.constant 1 : index
    %c0_27 = arith.constant 0 : index
    %c0_28 = arith.constant 0 : index
    %71 = vector.load %arg5[%c1, %c0_27, %c0_28] : memref<3x48x112xbf16, #tpu.memory_space<vmem>>, vector<1x48x112xbf16>
    %72 = vector.shape_cast %71 : vector<1x48x112xbf16> to vector<48x112xbf16>
    %cst_29 = arith.constant dense<0.000000e+00> : vector<14x112xf32>
    %73 = tpu.matmul %70, %72, %cst_29 {dimension_numbers = #tpu.dot_dimension_numbers<[1], [0], [0], [1], [0, 0, 1, 1], [], []>} : vector<14x48xbf16>, vector<48x112xbf16>, vector<14x112xf32> -> vector<14x112xf32>
    %74 = arith.addf %69, %73 : vector<14x112xf32>
    %75 = vector.extract_strided_slice %7 {offsets = [2, 0], sizes = [14, 48], strides = [1, 1]} : vector<16x48xbf16> to vector<14x48xbf16>
    %c2 = arith.constant 2 : index
    %c0_30 = arith.constant 0 : index
    %c0_31 = arith.constant 0 : index
    %76 = vector.load %arg5[%c2, %c0_30, %c0_31] : memref<3x48x112xbf16, #tpu.memory_space<vmem>>, vector<1x48x112xbf16>
    %77 = vector.shape_cast %76 : vector<1x48x112xbf16> to vector<48x112xbf16>
    %cst_32 = arith.constant dense<0.000000e+00> : vector<14x112xf32>
    %78 = tpu.matmul %75, %77, %cst_32 {dimension_numbers = #tpu.dot_dimension_numbers<[1], [0], [0], [1], [0, 0, 1, 1], [], []>} : vector<14x48xbf16>, vector<48x112xbf16>, vector<14x112xf32> -> vector<14x112xf32>
    %79 = arith.addf %74, %78 : vector<14x112xf32>
    %cst_33 = arith.constant 0.000000e+00 : f32
    %80 = vector.broadcast %cst_33 : f32 to vector<14x112xf32>
    %81 = arith.maximumf %79, %80 : vector<14x112xf32>
    %c0_34 = arith.constant 0 : index
    %c0_35 = arith.constant 0 : index
    %82 = vector.load %arg7[%c0_34, %c0_35] : memref<112x140xbf16, #tpu.memory_space<vmem>>, vector<112x140xbf16>
    %c0_36 = arith.constant 0 : index
    %c0_37 = arith.constant 0 : index
    %83 = vector.load %arg8[%c0_36, %c0_37] : memref<1x140xf32, #tpu.memory_space<vmem>>, vector<1x140xf32>
    %c0_38 = arith.constant 0 : index
    %c0_39 = arith.constant 0 : index
    %84 = vector.load %arg9[%c0_38, %c0_39] : memref<140x10xf32, #tpu.memory_space<vmem>>, vector<140x10xf32>
    %85 = arith.truncf %81 : vector<14x112xf32> to vector<14x112xbf16>
    %cst_40 = arith.constant dense<0.000000e+00> : vector<14x140xf32>
    %86 = tpu.matmul %85, %82, %cst_40 {dimension_numbers = #tpu.dot_dimension_numbers<[1], [0], [0], [1], [0, 0, 1, 1], [], []>} : vector<14x112xbf16>, vector<112x140xbf16>, vector<14x140xf32> -> vector<14x140xf32>
    %87 = vector.broadcast %83 : vector<1x140xf32> to vector<14x140xf32>
    %88 = arith.addf %86, %87 : vector<14x140xf32>
    %cst_41 = arith.constant 2.000000e+00 : f32
    %89 = vector.broadcast %cst_41 : f32 to vector<14x140xf32>
    %90 = arith.mulf %89, %88 : vector<14x140xf32>
    %cst_42 = arith.constant dense<0xFF800000> : vector<14xf32>
    %91 = vector.multi_reduction <maximumf>, %90, %cst_42 [1] : vector<14x140xf32> to vector<14xf32>
    %92 = vector.shape_cast %91 : vector<14xf32> to vector<14x1xf32>
    %cst_43 = arith.constant dense<0xFF800000> : vector<1xf32>
    %93 = vector.multi_reduction <maximumf>, %92, %cst_43 [0] : vector<14x1xf32> to vector<1xf32>
    %94 = vector.shape_cast %93 : vector<1xf32> to vector<1x1xf32>
    %cst_44 = arith.constant 0.000000e+00 : f32
    %95 = vector.broadcast %cst_44 : f32 to vector<14x140xf32>
    %96 = arith.subf %95, %90 : vector<14x140xf32>
    %cst_45 = arith.constant dense<0xFF800000> : vector<14xf32>
    %97 = vector.multi_reduction <maximumf>, %96, %cst_45 [1] : vector<14x140xf32> to vector<14xf32>
    %98 = vector.shape_cast %97 : vector<14xf32> to vector<14x1xf32>
    %cst_46 = arith.constant dense<0xFF800000> : vector<1xf32>
    %99 = vector.multi_reduction <maximumf>, %98, %cst_46 [0] : vector<14x1xf32> to vector<1xf32>
    %100 = vector.shape_cast %99 : vector<1xf32> to vector<1x1xf32>
    %101 = vector.broadcast %94 : vector<1x1xf32> to vector<14x140xf32>
    %102 = arith.subf %90, %101 : vector<14x140xf32>
    %103 = math.exp %102 : vector<14x140xf32>
    %cst_47 = arith.constant 0.000000e+00 : f32
    %104 = vector.broadcast %cst_47 : f32 to vector<14x140xf32>
    %105 = arith.subf %104, %90 : vector<14x140xf32>
    %106 = vector.broadcast %100 : vector<1x1xf32> to vector<14x140xf32>
    %107 = arith.subf %105, %106 : vector<14x140xf32>
    %108 = math.exp %107 : vector<14x140xf32>
    %cst_48 = arith.constant dense<0.000000e+00> : vector<140xf32>
    %109 = vector.multi_reduction <add>, %103, %cst_48 [0] : vector<14x140xf32> to vector<140xf32>
    %110 = vector.shape_cast %109 : vector<140xf32> to vector<1x140xf32>
    %cst_49 = arith.constant dense<0.000000e+00> : vector<140xf32>
    %111 = vector.multi_reduction <add>, %108, %cst_49 [0] : vector<14x140xf32> to vector<140xf32>
    %112 = vector.shape_cast %111 : vector<140xf32> to vector<1x140xf32>
    %113 = tpu.concatenate %110, %112 in 0 : vector<1x140xf32>, vector<1x140xf32> -> vector<2x140xf32>
    %cst_50 = arith.constant dense<0.000000e+00> : vector<2x10xf32>
    %114 = tpu.matmul %113, %84, %cst_50 {dimension_numbers = #tpu.dot_dimension_numbers<[1], [0], [0], [1], [0, 0, 1, 1], [], []>} : vector<2x140xf32>, vector<140x10xf32>, vector<2x10xf32> -> vector<2x10xf32>
    %115 = vector.extract_strided_slice %114 {offsets = [0, 0], sizes = [1, 10], strides = [1, 1]} : vector<2x10xf32> to vector<1x10xf32>
    %116 = math.log %115 : vector<1x10xf32>
    %117 = vector.broadcast %94 : vector<1x1xf32> to vector<1x10xf32>
    %118 = arith.addf %117, %116 : vector<1x10xf32>
    %119 = vector.extract_strided_slice %114 {offsets = [1, 0], sizes = [1, 10], strides = [1, 1]} : vector<2x10xf32> to vector<1x10xf32>
    %120 = math.log %119 : vector<1x10xf32>
    %121 = vector.broadcast %100 : vector<1x1xf32> to vector<1x10xf32>
    %122 = arith.addf %121, %120 : vector<1x10xf32>
    %123 = arith.maximumf %52, %118 : vector<1x10xf32>
    %124 = arith.subf %52, %123 : vector<1x10xf32>
    %125 = math.exp %124 : vector<1x10xf32>
    %126 = arith.subf %118, %123 : vector<1x10xf32>
    %127 = math.exp %126 : vector<1x10xf32>
    %128 = arith.addf %125, %127 : vector<1x10xf32>
    %129 = math.log %128 : vector<1x10xf32>
    %130 = arith.addf %123, %129 : vector<1x10xf32>
    %131 = arith.maximumf %60, %122 : vector<1x10xf32>
    %132 = arith.subf %60, %131 : vector<1x10xf32>
    %133 = math.exp %132 : vector<1x10xf32>
    %134 = arith.subf %122, %131 : vector<1x10xf32>
    %135 = math.exp %134 : vector<1x10xf32>
    %136 = arith.addf %133, %135 : vector<1x10xf32>
    %137 = math.log %136 : vector<1x10xf32>
    %138 = arith.addf %131, %137 : vector<1x10xf32>
    %c0_51 = arith.constant 0 : index
    %c0_52 = arith.constant 0 : index
    %139 = vector.load %arg11[%c0_51, %c0_52] : memref<1x96xf32, #tpu.memory_space<vmem>>, vector<1x96xf32>
    %cst_53 = arith.constant 0.000000e+00 : f32
    %140 = vector.broadcast %cst_53 : f32 to vector<12x96xf32>
    %141 = vector.broadcast %139 : vector<1x96xf32> to vector<12x96xf32>
    %142 = arith.addf %140, %141 : vector<12x96xf32>
    %143 = vector.extract_strided_slice %85 {offsets = [0, 0], sizes = [12, 112], strides = [1, 1]} : vector<14x112xbf16> to vector<12x112xbf16>
    %c0_54 = arith.constant 0 : index
    %c0_55 = arith.constant 0 : index
    %c0_56 = arith.constant 0 : index
    %144 = vector.load %arg10[%c0_54, %c0_55, %c0_56] : memref<3x112x96xbf16, #tpu.memory_space<vmem>>, vector<1x112x96xbf16>
    %145 = vector.shape_cast %144 : vector<1x112x96xbf16> to vector<112x96xbf16>
    %cst_57 = arith.constant dense<0.000000e+00> : vector<12x96xf32>
    %146 = tpu.matmul %143, %145, %cst_57 {dimension_numbers = #tpu.dot_dimension_numbers<[1], [0], [0], [1], [0, 0, 1, 1], [], []>} : vector<12x112xbf16>, vector<112x96xbf16>, vector<12x96xf32> -> vector<12x96xf32>
    %147 = arith.addf %142, %146 : vector<12x96xf32>
    %148 = vector.extract_strided_slice %85 {offsets = [1, 0], sizes = [12, 112], strides = [1, 1]} : vector<14x112xbf16> to vector<12x112xbf16>
    %c1_58 = arith.constant 1 : index
    %c0_59 = arith.constant 0 : index
    %c0_60 = arith.constant 0 : index
    %149 = vector.load %arg10[%c1_58, %c0_59, %c0_60] : memref<3x112x96xbf16, #tpu.memory_space<vmem>>, vector<1x112x96xbf16>
    %150 = vector.shape_cast %149 : vector<1x112x96xbf16> to vector<112x96xbf16>
    %cst_61 = arith.constant dense<0.000000e+00> : vector<12x96xf32>
    %151 = tpu.matmul %148, %150, %cst_61 {dimension_numbers = #tpu.dot_dimension_numbers<[1], [0], [0], [1], [0, 0, 1, 1], [], []>} : vector<12x112xbf16>, vector<112x96xbf16>, vector<12x96xf32> -> vector<12x96xf32>
    %152 = arith.addf %147, %151 : vector<12x96xf32>
    %153 = vector.extract_strided_slice %85 {offsets = [2, 0], sizes = [12, 112], strides = [1, 1]} : vector<14x112xbf16> to vector<12x112xbf16>
    %c2_62 = arith.constant 2 : index
    %c0_63 = arith.constant 0 : index
    %c0_64 = arith.constant 0 : index
    %154 = vector.load %arg10[%c2_62, %c0_63, %c0_64] : memref<3x112x96xbf16, #tpu.memory_space<vmem>>, vector<1x112x96xbf16>
    %155 = vector.shape_cast %154 : vector<1x112x96xbf16> to vector<112x96xbf16>
    %cst_65 = arith.constant dense<0.000000e+00> : vector<12x96xf32>
    %156 = tpu.matmul %153, %155, %cst_65 {dimension_numbers = #tpu.dot_dimension_numbers<[1], [0], [0], [1], [0, 0, 1, 1], [], []>} : vector<12x112xbf16>, vector<112x96xbf16>, vector<12x96xf32> -> vector<12x96xf32>
    %157 = arith.addf %152, %156 : vector<12x96xf32>
    %cst_66 = arith.constant 0.000000e+00 : f32
    %158 = vector.broadcast %cst_66 : f32 to vector<12x96xf32>
    %159 = arith.maximumf %157, %158 : vector<12x96xf32>
    %c0_67 = arith.constant 0 : index
    %c0_68 = arith.constant 0 : index
    %160 = vector.load %arg12[%c0_67, %c0_68] : memref<96x120xbf16, #tpu.memory_space<vmem>>, vector<96x120xbf16>
    %c0_69 = arith.constant 0 : index
    %c0_70 = arith.constant 0 : index
    %161 = vector.load %arg13[%c0_69, %c0_70] : memref<1x120xf32, #tpu.memory_space<vmem>>, vector<1x120xf32>
    %c0_71 = arith.constant 0 : index
    %c0_72 = arith.constant 0 : index
    %162 = vector.load %arg14[%c0_71, %c0_72] : memref<120x10xf32, #tpu.memory_space<vmem>>, vector<120x10xf32>
    %163 = arith.truncf %159 : vector<12x96xf32> to vector<12x96xbf16>
    %cst_73 = arith.constant dense<0.000000e+00> : vector<12x120xf32>
    %164 = tpu.matmul %163, %160, %cst_73 {dimension_numbers = #tpu.dot_dimension_numbers<[1], [0], [0], [1], [0, 0, 1, 1], [], []>} : vector<12x96xbf16>, vector<96x120xbf16>, vector<12x120xf32> -> vector<12x120xf32>
    %165 = vector.broadcast %161 : vector<1x120xf32> to vector<12x120xf32>
    %166 = arith.addf %164, %165 : vector<12x120xf32>
    %cst_74 = arith.constant 2.000000e+00 : f32
    %167 = vector.broadcast %cst_74 : f32 to vector<12x120xf32>
    %168 = arith.mulf %167, %166 : vector<12x120xf32>
    %cst_75 = arith.constant dense<0xFF800000> : vector<12xf32>
    %169 = vector.multi_reduction <maximumf>, %168, %cst_75 [1] : vector<12x120xf32> to vector<12xf32>
    %170 = vector.shape_cast %169 : vector<12xf32> to vector<12x1xf32>
    %cst_76 = arith.constant dense<0xFF800000> : vector<1xf32>
    %171 = vector.multi_reduction <maximumf>, %170, %cst_76 [0] : vector<12x1xf32> to vector<1xf32>
    %172 = vector.shape_cast %171 : vector<1xf32> to vector<1x1xf32>
    %cst_77 = arith.constant 0.000000e+00 : f32
    %173 = vector.broadcast %cst_77 : f32 to vector<12x120xf32>
    %174 = arith.subf %173, %168 : vector<12x120xf32>
    %cst_78 = arith.constant dense<0xFF800000> : vector<12xf32>
    %175 = vector.multi_reduction <maximumf>, %174, %cst_78 [1] : vector<12x120xf32> to vector<12xf32>
    %176 = vector.shape_cast %175 : vector<12xf32> to vector<12x1xf32>
    %cst_79 = arith.constant dense<0xFF800000> : vector<1xf32>
    %177 = vector.multi_reduction <maximumf>, %176, %cst_79 [0] : vector<12x1xf32> to vector<1xf32>
    %178 = vector.shape_cast %177 : vector<1xf32> to vector<1x1xf32>
    %179 = vector.broadcast %172 : vector<1x1xf32> to vector<12x120xf32>
    %180 = arith.subf %168, %179 : vector<12x120xf32>
    %181 = math.exp %180 : vector<12x120xf32>
    %cst_80 = arith.constant 0.000000e+00 : f32
    %182 = vector.broadcast %cst_80 : f32 to vector<12x120xf32>
    %183 = arith.subf %182, %168 : vector<12x120xf32>
    %184 = vector.broadcast %178 : vector<1x1xf32> to vector<12x120xf32>
    %185 = arith.subf %183, %184 : vector<12x120xf32>
    %186 = math.exp %185 : vector<12x120xf32>
    %cst_81 = arith.constant dense<0.000000e+00> : vector<120xf32>
    %187 = vector.multi_reduction <add>, %181, %cst_81 [0] : vector<12x120xf32> to vector<120xf32>
    %188 = vector.shape_cast %187 : vector<120xf32> to vector<1x120xf32>
    %cst_82 = arith.constant dense<0.000000e+00> : vector<120xf32>
    %189 = vector.multi_reduction <add>, %186, %cst_82 [0] : vector<12x120xf32> to vector<120xf32>
    %190 = vector.shape_cast %189 : vector<120xf32> to vector<1x120xf32>
    %191 = tpu.concatenate %188, %190 in 0 : vector<1x120xf32>, vector<1x120xf32> -> vector<2x120xf32>
    %cst_83 = arith.constant dense<0.000000e+00> : vector<2x10xf32>
    %192 = tpu.matmul %191, %162, %cst_83 {dimension_numbers = #tpu.dot_dimension_numbers<[1], [0], [0], [1], [0, 0, 1, 1], [], []>} : vector<2x120xf32>, vector<120x10xf32>, vector<2x10xf32> -> vector<2x10xf32>
    %193 = vector.extract_strided_slice %192 {offsets = [0, 0], sizes = [1, 10], strides = [1, 1]} : vector<2x10xf32> to vector<1x10xf32>
    %194 = math.log %193 : vector<1x10xf32>
    %195 = vector.broadcast %172 : vector<1x1xf32> to vector<1x10xf32>
    %196 = arith.addf %195, %194 : vector<1x10xf32>
    %197 = vector.extract_strided_slice %192 {offsets = [1, 0], sizes = [1, 10], strides = [1, 1]} : vector<2x10xf32> to vector<1x10xf32>
    %198 = math.log %197 : vector<1x10xf32>
    %199 = vector.broadcast %178 : vector<1x1xf32> to vector<1x10xf32>
    %200 = arith.addf %199, %198 : vector<1x10xf32>
    %201 = arith.maximumf %130, %196 : vector<1x10xf32>
    %202 = arith.subf %130, %201 : vector<1x10xf32>
    %203 = math.exp %202 : vector<1x10xf32>
    %204 = arith.subf %196, %201 : vector<1x10xf32>
    %205 = math.exp %204 : vector<1x10xf32>
    %206 = arith.addf %203, %205 : vector<1x10xf32>
    %207 = math.log %206 : vector<1x10xf32>
    %208 = arith.addf %201, %207 : vector<1x10xf32>
    %209 = arith.maximumf %138, %200 : vector<1x10xf32>
    %210 = arith.subf %138, %209 : vector<1x10xf32>
    %211 = math.exp %210 : vector<1x10xf32>
    %212 = arith.subf %200, %209 : vector<1x10xf32>
    %213 = math.exp %212 : vector<1x10xf32>
    %214 = arith.addf %211, %213 : vector<1x10xf32>
    %215 = math.log %214 : vector<1x10xf32>
    %216 = arith.addf %209, %215 : vector<1x10xf32>
    %c0_84 = arith.constant 0 : index
    %c0_85 = arith.constant 0 : index
    %217 = vector.load %arg16[%c0_84, %c0_85] : memref<1x80xf32, #tpu.memory_space<vmem>>, vector<1x80xf32>
    %cst_86 = arith.constant 0.000000e+00 : f32
    %218 = vector.broadcast %cst_86 : f32 to vector<10x80xf32>
    %219 = vector.broadcast %217 : vector<1x80xf32> to vector<10x80xf32>
    %220 = arith.addf %218, %219 : vector<10x80xf32>
    %221 = vector.extract_strided_slice %163 {offsets = [0, 0], sizes = [10, 96], strides = [1, 1]} : vector<12x96xbf16> to vector<10x96xbf16>
    %c0_87 = arith.constant 0 : index
    %c0_88 = arith.constant 0 : index
    %c0_89 = arith.constant 0 : index
    %222 = vector.load %arg15[%c0_87, %c0_88, %c0_89] : memref<3x96x80xbf16, #tpu.memory_space<vmem>>, vector<1x96x80xbf16>
    %223 = vector.shape_cast %222 : vector<1x96x80xbf16> to vector<96x80xbf16>
    %cst_90 = arith.constant dense<0.000000e+00> : vector<10x80xf32>
    %224 = tpu.matmul %221, %223, %cst_90 {dimension_numbers = #tpu.dot_dimension_numbers<[1], [0], [0], [1], [0, 0, 1, 1], [], []>} : vector<10x96xbf16>, vector<96x80xbf16>, vector<10x80xf32> -> vector<10x80xf32>
    %225 = arith.addf %220, %224 : vector<10x80xf32>
    %226 = vector.extract_strided_slice %163 {offsets = [1, 0], sizes = [10, 96], strides = [1, 1]} : vector<12x96xbf16> to vector<10x96xbf16>
    %c1_91 = arith.constant 1 : index
    %c0_92 = arith.constant 0 : index
    %c0_93 = arith.constant 0 : index
    %227 = vector.load %arg15[%c1_91, %c0_92, %c0_93] : memref<3x96x80xbf16, #tpu.memory_space<vmem>>, vector<1x96x80xbf16>
    %228 = vector.shape_cast %227 : vector<1x96x80xbf16> to vector<96x80xbf16>
    %cst_94 = arith.constant dense<0.000000e+00> : vector<10x80xf32>
    %229 = tpu.matmul %226, %228, %cst_94 {dimension_numbers = #tpu.dot_dimension_numbers<[1], [0], [0], [1], [0, 0, 1, 1], [], []>} : vector<10x96xbf16>, vector<96x80xbf16>, vector<10x80xf32> -> vector<10x80xf32>
    %230 = arith.addf %225, %229 : vector<10x80xf32>
    %231 = vector.extract_strided_slice %163 {offsets = [2, 0], sizes = [10, 96], strides = [1, 1]} : vector<12x96xbf16> to vector<10x96xbf16>
    %c2_95 = arith.constant 2 : index
    %c0_96 = arith.constant 0 : index
    %c0_97 = arith.constant 0 : index
    %232 = vector.load %arg15[%c2_95, %c0_96, %c0_97] : memref<3x96x80xbf16, #tpu.memory_space<vmem>>, vector<1x96x80xbf16>
    %233 = vector.shape_cast %232 : vector<1x96x80xbf16> to vector<96x80xbf16>
    %cst_98 = arith.constant dense<0.000000e+00> : vector<10x80xf32>
    %234 = tpu.matmul %231, %233, %cst_98 {dimension_numbers = #tpu.dot_dimension_numbers<[1], [0], [0], [1], [0, 0, 1, 1], [], []>} : vector<10x96xbf16>, vector<96x80xbf16>, vector<10x80xf32> -> vector<10x80xf32>
    %235 = arith.addf %230, %234 : vector<10x80xf32>
    %cst_99 = arith.constant 0.000000e+00 : f32
    %236 = vector.broadcast %cst_99 : f32 to vector<10x80xf32>
    %237 = arith.maximumf %235, %236 : vector<10x80xf32>
    %c0_100 = arith.constant 0 : index
    %c0_101 = arith.constant 0 : index
    %238 = vector.load %arg17[%c0_100, %c0_101] : memref<80x100xbf16, #tpu.memory_space<vmem>>, vector<80x100xbf16>
    %c0_102 = arith.constant 0 : index
    %c0_103 = arith.constant 0 : index
    %239 = vector.load %arg18[%c0_102, %c0_103] : memref<1x100xf32, #tpu.memory_space<vmem>>, vector<1x100xf32>
    %c0_104 = arith.constant 0 : index
    %c0_105 = arith.constant 0 : index
    %240 = vector.load %arg19[%c0_104, %c0_105] : memref<100x10xf32, #tpu.memory_space<vmem>>, vector<100x10xf32>
    %241 = arith.truncf %237 : vector<10x80xf32> to vector<10x80xbf16>
    %cst_106 = arith.constant dense<0.000000e+00> : vector<10x100xf32>
    %242 = tpu.matmul %241, %238, %cst_106 {dimension_numbers = #tpu.dot_dimension_numbers<[1], [0], [0], [1], [0, 0, 1, 1], [], []>} : vector<10x80xbf16>, vector<80x100xbf16>, vector<10x100xf32> -> vector<10x100xf32>
    %243 = vector.broadcast %239 : vector<1x100xf32> to vector<10x100xf32>
    %244 = arith.addf %242, %243 : vector<10x100xf32>
    %cst_107 = arith.constant 2.000000e+00 : f32
    %245 = vector.broadcast %cst_107 : f32 to vector<10x100xf32>
    %246 = arith.mulf %245, %244 : vector<10x100xf32>
    %cst_108 = arith.constant dense<0xFF800000> : vector<10xf32>
    %247 = vector.multi_reduction <maximumf>, %246, %cst_108 [1] : vector<10x100xf32> to vector<10xf32>
    %248 = vector.shape_cast %247 : vector<10xf32> to vector<10x1xf32>
    %cst_109 = arith.constant dense<0xFF800000> : vector<1xf32>
    %249 = vector.multi_reduction <maximumf>, %248, %cst_109 [0] : vector<10x1xf32> to vector<1xf32>
    %250 = vector.shape_cast %249 : vector<1xf32> to vector<1x1xf32>
    %cst_110 = arith.constant 0.000000e+00 : f32
    %251 = vector.broadcast %cst_110 : f32 to vector<10x100xf32>
    %252 = arith.subf %251, %246 : vector<10x100xf32>
    %cst_111 = arith.constant dense<0xFF800000> : vector<10xf32>
    %253 = vector.multi_reduction <maximumf>, %252, %cst_111 [1] : vector<10x100xf32> to vector<10xf32>
    %254 = vector.shape_cast %253 : vector<10xf32> to vector<10x1xf32>
    %cst_112 = arith.constant dense<0xFF800000> : vector<1xf32>
    %255 = vector.multi_reduction <maximumf>, %254, %cst_112 [0] : vector<10x1xf32> to vector<1xf32>
    %256 = vector.shape_cast %255 : vector<1xf32> to vector<1x1xf32>
    %257 = vector.broadcast %250 : vector<1x1xf32> to vector<10x100xf32>
    %258 = arith.subf %246, %257 : vector<10x100xf32>
    %259 = math.exp %258 : vector<10x100xf32>
    %cst_113 = arith.constant 0.000000e+00 : f32
    %260 = vector.broadcast %cst_113 : f32 to vector<10x100xf32>
    %261 = arith.subf %260, %246 : vector<10x100xf32>
    %262 = vector.broadcast %256 : vector<1x1xf32> to vector<10x100xf32>
    %263 = arith.subf %261, %262 : vector<10x100xf32>
    %264 = math.exp %263 : vector<10x100xf32>
    %cst_114 = arith.constant dense<0.000000e+00> : vector<100xf32>
    %265 = vector.multi_reduction <add>, %259, %cst_114 [0] : vector<10x100xf32> to vector<100xf32>
    %266 = vector.shape_cast %265 : vector<100xf32> to vector<1x100xf32>
    %cst_115 = arith.constant dense<0.000000e+00> : vector<100xf32>
    %267 = vector.multi_reduction <add>, %264, %cst_115 [0] : vector<10x100xf32> to vector<100xf32>
    %268 = vector.shape_cast %267 : vector<100xf32> to vector<1x100xf32>
    %269 = tpu.concatenate %266, %268 in 0 : vector<1x100xf32>, vector<1x100xf32> -> vector<2x100xf32>
    %cst_116 = arith.constant dense<0.000000e+00> : vector<2x10xf32>
    %270 = tpu.matmul %269, %240, %cst_116 {dimension_numbers = #tpu.dot_dimension_numbers<[1], [0], [0], [1], [0, 0, 1, 1], [], []>} : vector<2x100xf32>, vector<100x10xf32>, vector<2x10xf32> -> vector<2x10xf32>
    %271 = vector.extract_strided_slice %270 {offsets = [0, 0], sizes = [1, 10], strides = [1, 1]} : vector<2x10xf32> to vector<1x10xf32>
    %272 = math.log %271 : vector<1x10xf32>
    %273 = vector.broadcast %250 : vector<1x1xf32> to vector<1x10xf32>
    %274 = arith.addf %273, %272 : vector<1x10xf32>
    %275 = vector.extract_strided_slice %270 {offsets = [1, 0], sizes = [1, 10], strides = [1, 1]} : vector<2x10xf32> to vector<1x10xf32>
    %276 = math.log %275 : vector<1x10xf32>
    %277 = vector.broadcast %256 : vector<1x1xf32> to vector<1x10xf32>
    %278 = arith.addf %277, %276 : vector<1x10xf32>
    %279 = arith.maximumf %208, %274 : vector<1x10xf32>
    %280 = arith.subf %208, %279 : vector<1x10xf32>
    %281 = math.exp %280 : vector<1x10xf32>
    %282 = arith.subf %274, %279 : vector<1x10xf32>
    %283 = math.exp %282 : vector<1x10xf32>
    %284 = arith.addf %281, %283 : vector<1x10xf32>
    %285 = math.log %284 : vector<1x10xf32>
    %286 = arith.addf %279, %285 : vector<1x10xf32>
    %287 = arith.maximumf %216, %278 : vector<1x10xf32>
    %288 = arith.subf %216, %287 : vector<1x10xf32>
    %289 = math.exp %288 : vector<1x10xf32>
    %290 = arith.subf %278, %287 : vector<1x10xf32>
    %291 = math.exp %290 : vector<1x10xf32>
    %292 = arith.addf %289, %291 : vector<1x10xf32>
    %293 = math.log %292 : vector<1x10xf32>
    %294 = arith.addf %287, %293 : vector<1x10xf32>
    %295 = arith.addf %286, %294 : vector<1x10xf32>
    %cst_117 = arith.constant 5.000000e-01 : f32
    %296 = vector.broadcast %cst_117 : f32 to vector<1x10xf32>
    %297 = arith.mulf %295, %296 : vector<1x10xf32>
    %c0_118 = arith.constant 0 : index
    %c0_119 = arith.constant 0 : index
    %c0_120 = arith.constant 0 : index
    %298 = vector.load %arg20[%c0_118, %c0_119, %c0_120] : memref<1x1x10xf32, #tpu.memory_space<vmem>>, vector<1x1x10xf32>
    %299 = vector.shape_cast %298 : vector<1x1x10xf32> to vector<1x10xf32>
    %300 = vector.shape_cast %297 : vector<1x10xf32> to vector<1x1x10xf32>
    tpu.vector_store %arg20[%c0_118, %c0_119, %c0_120], %300 {strides = array<i32>} : memref<1x1x10xf32, #tpu.memory_space<vmem>>, vector<1x1x10xf32>,
    return
  }
  func.func @transform_0(%arg0: i32) -> (i32, i32, i32) {
    %c0_i32 = arith.constant 0 : i32
    %c0_i32_0 = arith.constant 0 : i32
    %c0_i32_1 = arith.constant 0 : i32
    return %arg0, %c0_i32, %c0_i32_0 : i32, i32, i32
  }
  func.func @transform_1(%arg0: i32) -> (i32, i32) {
    %c0_i32 = arith.constant 0 : i32
    %c0_i32_0 = arith.constant 0 : i32
    %c0_i32_1 = arith.constant 0 : i32
    return %c0_i32, %c0_i32_0 : i32, i32
  }
  func.func @transform_2(%arg0: i32) -> (i32, i32) {
    %c0_i32 = arith.constant 0 : i32
    %c0_i32_0 = arith.constant 0 : i32
    %c0_i32_1 = arith.constant 0 : i32
    return %c0_i32, %c0_i32_0 : i32, i32
  }
  func.func @transform_3(%arg0: i32) -> (i32, i32) {
    %c0_i32 = arith.constant 0 : i32
    %c0_i32_0 = arith.constant 0 : i32
    %c0_i32_1 = arith.constant 0 : i32
    return %c0_i32, %c0_i32_0 : i32, i32
  }
  func.func @transform_4(%arg0: i32) -> (i32, i32, i32) {
    %c0_i32 = arith.constant 0 : i32
    %c0_i32_0 = arith.constant 0 : i32
    %c0_i32_1 = arith.constant 0 : i32
    %c0_i32_2 = arith.constant 0 : i32
    return %c0_i32, %c0_i32_0, %c0_i32_1 : i32, i32, i32
  }
  func.func @transform_5(%arg0: i32) -> (i32, i32) {
    %c0_i32 = arith.constant 0 : i32
    %c0_i32_0 = arith.constant 0 : i32
    %c0_i32_1 = arith.constant 0 : i32
    return %c0_i32, %c0_i32_0 : i32, i32
  }
  func.func @transform_6(%arg0: i32) -> (i32, i32) {
    %c0_i32 = arith.constant 0 : i32
    %c0_i32_0 = arith.constant 0 : i32
    %c0_i32_1 = arith.constant 0 : i32
    return %c0_i32, %c0_i32_0 : i32, i32
  }
  func.func @transform_7(%arg0: i32) -> (i32, i32) {
    %c0_i32 = arith.constant 0 : i32
    %c0_i32_0 = arith.constant 0 : i32
    %c0_i32_1 = arith.constant 0 : i32
    return %c0_i32, %c0_i32_0 : i32, i32
  }
  func.func @transform_8(%arg0: i32) -> (i32, i32) {
    %c0_i32 = arith.constant 0 : i32
    %c0_i32_0 = arith.constant 0 : i32
    %c0_i32_1 = arith.constant 0 : i32
    return %c0_i32, %c0_i32_0 : i32, i32
  }
  func.func @transform_9(%arg0: i32) -> (i32, i32, i32) {
    %c0_i32 = arith.constant 0 : i32
    %c0_i32_0 = arith.constant 0 : i32
    %c0_i32_1 = arith.constant 0 : i32
    %c0_i32_2 = arith.constant 0 : i32
    return %c0_i32, %c0_i32_0, %c0_i32_1 : i32, i32, i32
  }
  func.func @transform_10(%arg0: i32) -> (i32, i32) {
    %c0_i32 = arith.constant 0 : i32
    %c0_i32_0 = arith.constant 0 : i32
    %c0_i32_1 = arith.constant 0 : i32
    return %c0_i32, %c0_i32_0 : i32, i32
  }
  func.func @transform_11(%arg0: i32) -> (i32, i32) {
    %c0_i32 = arith.constant 0 : i32
    %c0_i32_0 = arith.constant 0 : i32
    %c0_i32_1 = arith.constant 0 : i32
    return %c0_i32, %c0_i32_0 : i32, i32
  }
  func.func @transform_12(%arg0: i32) -> (i32, i32) {
    %c0_i32 = arith.constant 0 : i32
    %c0_i32_0 = arith.constant 0 : i32
    %c0_i32_1 = arith.constant 0 : i32
    return %c0_i32, %c0_i32_0 : i32, i32
  }
  func.func @transform_13(%arg0: i32) -> (i32, i32) {
    %c0_i32 = arith.constant 0 : i32
    %c0_i32_0 = arith.constant 0 : i32
    %c0_i32_1 = arith.constant 0 : i32
    return %c0_i32, %c0_i32_0 : i32, i32
  }
  func.func @transform_14(%arg0: i32) -> (i32, i32, i32) {
    %c0_i32 = arith.constant 0 : i32
    %c0_i32_0 = arith.constant 0 : i32
    %c0_i32_1 = arith.constant 0 : i32
    %c0_i32_2 = arith.constant 0 : i32
    return %c0_i32, %c0_i32_0, %c0_i32_1 : i32, i32, i32
  }
  func.func @transform_15(%arg0: i32) -> (i32, i32) {
    %c0_i32 = arith.constant 0 : i32
    %c0_i32_0 = arith.constant 0 : i32
    %c0_i32_1 = arith.constant 0 : i32
    return %c0_i32, %c0_i32_0 : i32, i32
  }
  func.func @transform_16(%arg0: i32) -> (i32, i32) {
    %c0_i32 = arith.constant 0 : i32
    %c0_i32_0 = arith.constant 0 : i32
    %c0_i32_1 = arith.constant 0 : i32
    return %c0_i32, %c0_i32_0 : i32, i32
  }
  func.func @transform_17(%arg0: i32) -> (i32, i32) {
    %c0_i32 = arith.constant 0 : i32
    %c0_i32_0 = arith.constant 0 : i32
    %c0_i32_1 = arith.constant 0 : i32
    return %c0_i32, %c0_i32_0 : i32, i32
  }
  func.func @transform_18(%arg0: i32) -> (i32, i32) {
    %c0_i32 = arith.constant 0 : i32
    %c0_i32_0 = arith.constant 0 : i32
    %c0_i32_1 = arith.constant 0 : i32
    return %c0_i32, %c0_i32_0 : i32, i32
  }
  func.func @transform_19(%arg0: i32) -> (i32, i32, i32) {
    %c0_i32 = arith.constant 0 : i32
    %c0_i32_0 = arith.constant 0 : i32
    %c0_i32_1 = arith.constant 0 : i32
    return %arg0, %c0_i32, %c0_i32_0 : i32, i32, i32
  }
}

</mosaic_0001>

<bundles_post_ra>
// kernel: forward.1
= control target key start
LH: loop header
LB: loop body
LE: loop exit
PB: predicated region body
PF: predicated region fallthrough
CT: control target
= control target key end

     0   :  { %s5358_s0 = inlined_call_operand.vmem [shape: f32[2,16,48], index: 0, kind: input, shape index: {}]   ;;  %s5359_s1 = inlined_call_operand.vmem [shape: bf16[48,160], index: 1, kind: input, shape index: {}]   ;;  %s5360_s2 = inlined_call_operand.hbm [shape: f32[1,160], index: 2, kind: input, shape index: {}]   ;;  %s5361_s3 = inlined_call_operand.vmem [shape: f32[160,10], index: 3, kind: input, shape index: {}]   ;;  %s5362_s4 = inlined_call_operand.vmem [shape: bf16[3,48,112], index: 4, kind: input, shape index: {}]   ;;  %s5363_s5 = inlined_call_operand.hbm [shape: f32[1,112], index: 5, kind: input, shape index: {}]   ;;  %s5364_s6 = inlined_call_operand.vmem [shape: bf16[112,140], index: 6, kind: input, shape index: {}]   ;;  %s5365_s7 = inlined_call_operand.hbm [shape: f32[1,140], index: 7, kind: input, shape index: {}]   ;;  %s5366_s8 = inlined_call_operand.vmem [shape: f32[140,10], index: 8, kind: input, shape index: {}]   ;;  %s5367_s9 = inlined_call_operand.vmem [shape: bf16[3,112,96], index: 9, kind: input, shape index: {}]   ;;  %s5368_s10 = inlined_call_operand.hbm [shape: f32[1,96], index: 10, kind: input, shape index: {}]   ;;  %s5369_s11 = inlined_call_operand.hbm [shape: bf16[96,120], index: 11, kind: input, shape index: {}]   ;;  %s5370_s12 = inlined_call_operand.hbm [shape: f32[1,120], index: 12, kind: input, shape index: {}]   ;;  %s5371_s13 = inlined_call_operand.hbm [shape: f32[120,10], index: 13, kind: input, shape index: {}]   ;;  %s5372_s14 = inlined_call_operand.vmem [shape: bf16[3,96,80], index: 14, kind: input, shape index: {}]   ;;  %s5373_s15 = inlined_call_operand.vmem [shape: f32[1,80], index: 15, kind: input, shape index: {}]   ;;  %s5374_s16 = inlined_call_operand.vmem [shape: bf16[80,100], index: 16, kind: input, shape index: {}]   ;;  %s5375_s17 = inlined_call_operand.vmem [shape: f32[1,100], index: 17, kind: input, shape index: {}]   ;;  %s5376_s18 = inlined_call_operand.hbm [shape: f32[100,10], index: 18, kind: input, shape index: {}]   ;;  %s5377_s19 = inlined_call_operand.hbm [shape: f32[2,1,10], index: 19, kind: output, shape index: {}]  }
   0x1   :  { %5394 = sst [smem:[#allocation31_spill]] %s5358_s0 }
   0x2   :  { %5395 = sst [smem:[#allocation32_spill]] %s5359_s1 }
   0x3   :  { %5396 = sst [smem:[#allocation33_spill]] %s5360_s2 }
   0x4   :  { %5397 = sst [smem:[#allocation34_spill]] %s5361_s3 }
   0x5   :  { %5398 = sst [smem:[#allocation35_spill]] %s5363_s5 }
   0x6   :  { %5399 = sst [smem:[#allocation36_spill]] %s5365_s7 }
   0x7   :  { %5400 = sst [smem:[#allocation37_spill]] %s5368_s10 }
   0x8   :  { %5401 = sst [smem:[#allocation38_spill]] %s5377_s19 }
   0x9   :  { %24 = vsyncpa [#allocation3], 0 }
   0xa   :  { %25 = vsyncpa [#allocation6], 0 }
   0xb   :  { %26 = vsyncpa [#allocation9], 0 }
   0xc   :  { %27 = vsyncpa [#allocation12], 0 }
   0xd   :  { %28 = vsyncpa [#allocation15], 0 }
   0xe   :  { %29 = vsyncpa [#allocation4], 0 }
   0xf   :  { %31 = vsyncpa [#allocation4 + $0x1], 0  ;;  %s4342_s0 = smov 0   ;;  %s4344_s30 = smov 0  }
  0x10   :  { %s4346_s20 = smov 0   ;;  %s4348_s21 = smov 0  }
  0x11 LB: > { %5402 = sst [smem:[#allocation23_spill]] %s4210_s0  ;;  %s4363_s1 = sadd.s32 4294967295, %s4222_s21   ;;  %s4222_s21 = sphi %s4348_s21, %s5441_s21   ;;  %s4218_s20 = sphi %s4346_s20, %s5444_s20   ;;  %s4214_s30 = sphi %s4344_s30, %s5443_s30   ;;  %s4210_s0 = sphi %s4342_s0, %s5442_s0  }
  0x12   : > { %5403 = sst [smem:[#allocation24_spill]] %s4214_s30  ;;  %s2950_s22 = sadd.s32 4294967294, %s4222_s21  }
  0x13   : > { %5404 = sst [smem:[#allocation25_spill]] %s4218_s20  ;;  %s4367_s2 = sadd.s32 1, %s4222_s21  }
  0x14   : > { %5405 = sst [smem:[#allocation26_spill]] %s4222_s21  ;;  %s448_s23 = sadd.s32 1, %s4218_s20 }
  0x15   : > { %5406 = sst [smem:[#allocation27_spill]] %s4367_s2  ;;  %s445_s24 = ssub.s32 %s4222_s21, %s4367_s2 }
  0x16   : > { %p458_p0 = scmp.ne.s32.totalorder %s4218_s20, %s4214_s30  ;;  %p446_p1 = scmp.eq.s32.totalorder %s445_s24, 0 }
  0x17   : > { %p459_p2 = scmp.eq.s32.totalorder %s4363_s1, 1  ;;  %p464_p3 = scmp.ne.s32.totalorder %s4214_s30, %s4210_s0 }
  0x18   : > { %p465_p4 = scmp.eq.s32.totalorder %s2950_s22, 1  ;;  %p2951_p7 = scmp.ge.s32.totalorder %s4222_s21, 1 }
  0x19   : > { %s4378_s25 = scalar_select %p446_p1, %s4218_s20, %s448_s23  }
  0x1a   : > { %p4380_p5 = por %p459_p2, %p458_p0  ;;  %p4384_p6 = por %p465_p4, %p464_p3 }
  0x1b   : > { %5407 = sst [smem:[#allocation28_spill]] %s4378_s25  ;;  %p472_p8 = scmp.lt.s32.totalorder %s4222_s21, 3 }
  0x1c   : > { %s5408_s3 = scalar_select %p4380_p5, 1, 0 }
  0x1d   : > { %s5410_s26 = scalar_select %p4384_p6, 1, 0 }
  0x1e   : > { %5409 = sst [smem:[#allocation29_spill]] %s5408_s3  ;;  %p5388_p9 = scmp.eq.s32.totalorder %s4363_s1, 0 }
  0x1f   : > { %5411 = sst [smem:[#allocation30_spill]] %s5410_s26  ;;  %p4391_p10 = pnand %p2951_p7, %p472_p8 }
  0x20   : > { %s4224_s28 = smov [#allocation5]   ;;  %s4225_s22 = smov [#allocation8]  }
  0x21   : > { %s5412_s27 = scalar_select %p4391_p10, 1, 0 }
  0x22   : > { %s505_s29 = sshll.u32 %s4224_s28, 4  ;;  %p3628_p11 = pneg %p4391_p10  ;;  %s506_s29 = int_to_ptr.vmem [resolvable:$true] %s505_s29 }
  0x23   : > { %s536_s23 = sshll.u32 %s4225_s22, 4  ;;  %s4226_s25 = smov [#allocation11]   ;;  %s4403_s23 = int_to_ptr.vmem [resolvable:$true] %s536_s23 }
  0x24   : > { %p4399_p12 = pnand %p5388_p9, %p3628_p11  ;;  %s560_s20 = sshll.u32 %s4226_s25, 4  ;;  %s4405_s20 = int_to_ptr.vmem [resolvable:$true] %s560_s20 }
  0x25   : > { %s5414_s5 = sld [smem:[#allocation35_spill]] }
  0x26   : > { %p4415_p0 = pneg %p4399_p12 }
  0x2b   : > { %s3916_s28 = scalar_lea.hbm %s5414_s5, 16 }
  0x2c   : > { %p3917_p13 = scmp.ne.s32.totalorder %s5414_s5, %s3916_s28  ;;  %p3923_p3 = scmp.lt.u32.totalorder %s3916_s28, %s5414_s5 }
  0x2e   : > { %p3919_p1 = pnand %p4415_p0, %p3917_p13 }
  0x30   : > { %p3920_p2 = pneg %p3919_p1 }
  0x32   : > { %p3925_p4 = pnand %p3923_p3, %p3920_p2 }
  0x34   : > { %3928 = shalt.err (!%p3925_p4)
}
  0x35   : > { %s3929_s2 = scalar_lea.vmem %s506_s29, 16  ;;  %s3936_s0 = scalar_lea.vmem %s506_s29, 32 }
  0x36   : > { %p3930_p7 = scmp.ne.s32.totalorder %s506_s29, %s3929_s2  ;;  %p3937_p9 = scmp.lt.s32.totalorder %s506_s29, %s506_s29 }
  0x37   : > { %p3938_p6 = scmp.lt.s32.totalorder %s3936_s0, %s3929_s2 }
  0x38   : > { %p3932_p8 = pnand %p3930_p7, %p4415_p0 }
  0x39   : > { %p3939_p5 = por %p3938_p6, %p3937_p9 }
  0x3a   : > { %p3933_p11 = pneg %p3932_p8 }
  0x3c   : > { %p3940_p10 = pnand %p3939_p5, %p3933_p11 }
  0x3e   : > { %3943 = shalt.err (!%p3940_p10)
}
  0x3f   : > { %3634 = dma.hbm_to_vmem [thread:$0]  (!%p4399_p12), %s5414_s5, 16, %s506_s29, [#allocation6]  }
  0x40   : > { %s5416_s10 = sld [smem:[#allocation37_spill]] }
  0x46   : > { %s3944_s25 = scalar_lea.hbm %s5416_s10, 16 }
  0x47   : > { %p3945_p13 = scmp.ne.s32.totalorder %s5416_s10, %s3944_s25  ;;  %p3951_p5 = scmp.lt.u32.totalorder %s3944_s25, %s5416_s10 }
  0x49   : > { %p3947_p1 = pnand %p3945_p13, %p4415_p0 }
  0x4b   : > { %p3948_p6 = pneg %p3947_p1 }
  0x4d   : > { %p3953_p9 = pnand %p3951_p5, %p3948_p6 }
  0x4f   : > { %3956 = shalt.err (!%p3953_p9)
}
  0x50   : > { %s3957_s29 = scalar_lea.vmem %s4403_s23, 16  ;;  %s3964_s30 = scalar_lea.vmem %s4403_s23, 32 }
  0x51   : > { %p3958_p10 = scmp.ne.s32.totalorder %s4403_s23, %s3957_s29  ;;  %p3965_p4 = scmp.lt.s32.totalorder %s4403_s23, %s4403_s23 }
  0x52   : > { %p3966_p7 = scmp.lt.s32.totalorder %s3964_s30, %s3957_s29 }
  0x53   : > { %p3960_p2 = pnand %p3958_p10, %p4415_p0 }
  0x54   : > { %p3967_p8 = por %p3966_p7, %p3965_p4 }
  0x55   : > { %p3961_p3 = pneg %p3960_p2 }
  0x57   : > { %p3968_p11 = pnand %p3967_p8, %p3961_p3 }
  0x59   : > { %3971 = shalt.err (!%p3968_p11)
}
  0x5a   : > { %3640 = dma.hbm_to_vmem [thread:$0]  (!%p4399_p12), %s5416_s10, 16, %s4403_s23, [#allocation9]  }
  0x5b   : > { %s3972_s28 = scalar_lea.hbm %s5370_s12, 16 }
  0x5c   : > { %p3973_p13 = scmp.ne.s32.totalorder %s5370_s12, %s3972_s28  ;;  %p3979_p5 = scmp.lt.u32.totalorder %s3972_s28, %s5370_s12 }
  0x5e   : > { %p3975_p1 = pnand %p3973_p13, %p4415_p0 }
  0x60   : > { %p3976_p6 = pneg %p3975_p1 }
  0x62   : > { %p3981_p9 = pnand %p3979_p5, %p3976_p6 }
  0x64   : > { %3984 = shalt.err (!%p3981_p9)
}
  0x65   : > { %s3985_s23 = scalar_lea.vmem %s4405_s20, 16  ;;  %s3992_s30 = scalar_lea.vmem %s4405_s20, 32 }
  0x66   : > { %p3986_p10 = scmp.ne.s32.totalorder %s4405_s20, %s3985_s23  ;;  %p3993_p4 = scmp.lt.s32.totalorder %s4405_s20, %s4405_s20 }
  0x67   : > { %p3994_p7 = scmp.lt.s32.totalorder %s3992_s30, %s3985_s23 }
  0x68   : > { %p3988_p2 = pnand %p3986_p10, %p4415_p0 }
  0x69   : > { %p3995_p8 = por %p3994_p7, %p3993_p4 }
  0x6a   : > { %p3989_p3 = pneg %p3988_p2 }
  0x6c   : > { %p3996_p11 = pnand %p3995_p8, %p3989_p3 }
  0x6e   : > { %3999 = shalt.err (!%p3996_p11)
}
  0x6f   : > { %3646 = dma.hbm_to_vmem [thread:$0]  (!%p4399_p12), %s5370_s12, 16, %s4405_s20, [#allocation12]  }
  0x70   : > { %s4227_s26 = smov [#allocation2]   ;;  %s4228_s28 = smov [#allocation7]  }
  0x71   : > { %s488_s19 = sshll.u32 %s4227_s26, 4  ;;  %s519_s25 = sshll.u32 %s4228_s28, 4  ;;  %s489_s19 = int_to_ptr.vmem [resolvable:$true] %s488_s19  ;;  %s520_s25 = int_to_ptr.vmem [resolvable:$true] %s519_s25 }
  0x72   : > { %s5417_s29 = sld [smem:[#allocation33_spill]] }
  0x78   : > { %s4000_s23 = scalar_lea.hbm %s5417_s29, 32 }
  0x79   : > { %p4001_p13 = scmp.ne.s32.totalorder %s5417_s29, %s4000_s23  ;;  %p4007_p5 = scmp.lt.u32.totalorder %s4000_s23, %s5417_s29 }
  0x7b   : > { %p4003_p1 = pnand %p4001_p13, %p4415_p0 }
  0x7d   : > { %p4004_p6 = pneg %p4003_p1 }
  0x7f   : > { %p4009_p9 = pnand %p4007_p5, %p4004_p6 }
  0x81   : > { %4012 = shalt.err (!%p4009_p9)
}
  0x82   : > { %s4013_s20 = scalar_lea.vmem %s489_s19, 32  ;;  %p4021_p4 = scmp.lt.s32.totalorder %s489_s19, %s489_s19 }
  0x83   : > { %p4014_p10 = scmp.ne.s32.totalorder %s489_s19, %s4013_s20  ;;  %p4022_p7 = scmp.lt.s32.totalorder %s4013_s20, %s4013_s20 }
  0x85   : > { %p4016_p2 = pnand %p4014_p10, %p4415_p0  ;;  %p4023_p8 = por %p4022_p7, %p4021_p4 }
  0x87   : > { %p4017_p3 = pneg %p4016_p2 }
  0x89   : > { %p4024_p11 = pnand %p4023_p8, %p4017_p3 }
  0x8b   : > { %4027 = shalt.err (!%p4024_p11)
}
  0x8c   : > { %3631 = dma.hbm_to_vmem [thread:$0]  (!%p4399_p12), %s5417_s29, 32, %s489_s19, [#allocation3]  }
  0x8d   : > { %s5418_s7 = sld [smem:[#allocation36_spill]] }
  0x93   : > { %s4028_s28 = scalar_lea.hbm %s5418_s7, 32 }
  0x94   : > { %p4029_p13 = scmp.ne.s32.totalorder %s5418_s7, %s4028_s28  ;;  %p4035_p5 = scmp.lt.u32.totalorder %s4028_s28, %s5418_s7 }
  0x96   : > { %p4031_p1 = pnand %p4029_p13, %p4415_p0 }
  0x98   : > { %p4032_p6 = pneg %p4031_p1 }
  0x9a   : > { %p4037_p9 = pnand %p4035_p5, %p4032_p6 }
  0x9c   : > { %4040 = shalt.err (!%p4037_p9)
}
  0x9d   : > { %s4041_s3 = scalar_lea.vmem %s520_s25, 32  ;;  %p4049_p4 = scmp.lt.s32.totalorder %s520_s25, %s520_s25 }
  0x9e   : > { %p4042_p10 = scmp.ne.s32.totalorder %s520_s25, %s4041_s3  ;;  %p4050_p7 = scmp.lt.s32.totalorder %s4041_s3, %s4041_s3 }
  0xa0   : > { %p4044_p2 = pnand %p4042_p10, %p4415_p0  ;;  %p4051_p8 = por %p4050_p7, %p4049_p4 }
  0xa2   : > { %p4045_p3 = pneg %p4044_p2 }
  0xa4   : > { %p4052_p11 = pnand %p4051_p8, %p4045_p3 }
  0xa6   : > { %4055 = shalt.err (!%p4052_p11)
}
  0xa7   : > { %3637 = dma.hbm_to_vmem [thread:$0]  (!%p4399_p12), %s5418_s7, 32, %s520_s25, [#allocation6]  }
  0xa8   : > { %s4229_s5 = smov [#allocation10]   ;;  %s4056_s28 = scalar_lea.hbm %s5369_s11, 768 }
  0xa9   : > { %s546_s21 = sshll.u32 %s4229_s5, 4  ;;  %p4057_p13 = scmp.ne.s32.totalorder %s5369_s11, %s4056_s28  ;;  %s547_s21 = int_to_ptr.vmem [resolvable:$true] %s546_s21 }
  0xaa   : > { %p4063_p5 = scmp.lt.u32.totalorder %s4056_s28, %s5369_s11 }
  0xab   : > { %p4059_p1 = pnand %p4057_p13, %p4415_p0 }
  0xad   : > { %p4060_p6 = pneg %p4059_p1 }
  0xaf   : > { %p4065_p9 = pnand %p4063_p5, %p4060_p6 }
  0xb1   : > { %4068 = shalt.err (!%p4065_p9)
}
  0xb2   : > { %s4069_s25 = scalar_lea.vmem %s547_s21, 768  ;;  %p4077_p4 = scmp.lt.s32.totalorder %s547_s21, %s547_s21 }
  0xb3   : > { %p4070_p10 = scmp.ne.s32.totalorder %s547_s21, %s4069_s25  ;;  %p4078_p7 = scmp.lt.s32.totalorder %s4069_s25, %s4069_s25 }
  0xb5   : > { %p4072_p2 = pnand %p4070_p10, %p4415_p0  ;;  %p4079_p8 = por %p4078_p7, %p4077_p4 }
  0xb7   : > { %p4073_p3 = pneg %p4072_p2 }
  0xb9   : > { %p4080_p11 = pnand %p4079_p8, %p4073_p3 }
  0xbb   : > { %4083 = shalt.err (!%p4080_p11)
}
  0xbc   : > { %s4230_s3 = smov 64   ;;  %s4231_s19 = smov 4  }
  0xbd   : > { %3643 = dma.hbm_to_vmem [thread:$0]  (!%p4399_p12), %s5369_s11, 768, %s547_s21, [#allocation9], %s4230_s3, %s4230_s3, %s4231_s19  }
  0xbe   : > { %s4232_s10 = smov [#allocation13]   ;;  %s4084_s0 = scalar_lea.hbm %s5371_s13, 1920 }
  0xbf   : > { %s570_s26 = sshll.u32 %s4232_s10, 4  ;;  %p4085_p13 = scmp.ne.s32.totalorder %s5371_s13, %s4084_s0  ;;  %s571_s26 = int_to_ptr.vmem [resolvable:$true] %s570_s26 }
  0xc0   : > { %p4091_p5 = scmp.lt.u32.totalorder %s4084_s0, %s5371_s13 }
  0xc1   : > { %p4087_p1 = pnand %p4085_p13, %p4415_p0 }
  0xc3   : > { %p4088_p6 = pneg %p4087_p1 }
  0xc5   : > { %p4093_p9 = pnand %p4091_p5, %p4088_p6 }
  0xc7   : > { %4096 = shalt.err (!%p4093_p9)
}
  0xc8   : > { %s4097_s21 = scalar_lea.vmem %s571_s26, 1920  ;;  %p4105_p4 = scmp.lt.s32.totalorder %s571_s26, %s571_s26 }
  0xc9   : > { %p4098_p10 = scmp.ne.s32.totalorder %s571_s26, %s4097_s21  ;;  %p4106_p7 = scmp.lt.s32.totalorder %s4097_s21, %s4097_s21 }
  0xcb   : > { %p4100_p2 = pnand %p4098_p10, %p4415_p0  ;;  %p4107_p8 = por %p4106_p7, %p4105_p4 }
  0xcd   : > { %p4101_p3 = pneg %p4100_p2 }
  0xcf   : > { %p4108_p11 = pnand %p4107_p8, %p4101_p3 }
  0xd1   : > { %4111 = shalt.err (!%p4108_p11)
}
  0xd2   : > { %s4233_s3 = smov 128   ;;  %s4234_s19 = smov 8  }
  0xd3   : > { %3649 = dma.hbm_to_vmem [thread:$0]  (!%p4399_p12), %s5371_s13, 1920, %s571_s26, [#allocation12], %s4233_s3, %s4233_s3, %s4234_s19  }
  0xd4   : > { %s4235_s5 = smov [#allocation14]   ;;  %s4112_s0 = scalar_lea.hbm %s5376_s18, 1664 }
  0xd5   : > { %s595_s10 = sshll.u32 %s4235_s5, 4  ;;  %p4113_p13 = scmp.ne.s32.totalorder %s5376_s18, %s4112_s0  ;;  %s596_s10 = int_to_ptr.vmem [resolvable:$true] %s595_s10 }
  0xd6   : > { %p4119_p5 = scmp.lt.u32.totalorder %s4112_s0, %s5376_s18 }
  0xd7   : > { %p4115_p1 = pnand %p4113_p13, %p4415_p0 }
  0xd9   : > { %p4116_p6 = pneg %p4115_p1 }
  0xdb   : > { %p4121_p9 = pnand %p4119_p5, %p4116_p6 }
  0xdd   : > { %4124 = shalt.err (!%p4121_p9)
}
  0xde   : > { %s4125_s26 = scalar_lea.vmem %s596_s10, 1664  ;;  %p4133_p4 = scmp.lt.s32.totalorder %s596_s10, %s596_s10 }
  0xdf   : > { %p4126_p10 = scmp.ne.s32.totalorder %s596_s10, %s4125_s26  ;;  %p4134_p7 = scmp.lt.s32.totalorder %s4125_s26, %s4125_s26 }
  0xe1   : > { %p4128_p2 = pnand %p4126_p10, %p4415_p0  ;;  %p4135_p8 = por %p4134_p7, %p4133_p4 }
  0xe3   : > { %p4129_p3 = pneg %p4128_p2 }
  0xe5   : > { %p4136_p11 = pnand %p4135_p8, %p4129_p3 }
  0xe7   : > { %4139 = shalt.err (!%p4136_p11)
}
  0xe8   : > { %3652 = dma.hbm_to_vmem [thread:$0]  (!%p4399_p12), %s5376_s18, 1664, %s596_s10, [#allocation15], %s4233_s3, %s4233_s3, %s4234_s19  }
  0xe9   : > { %p5419_p13 = scmp.ne.s32.totalorder %s5412_s27, 0 }
  0xea   : > { %p5420_p1 = scmp.eq.s32.totalorder (!%p5419_p13), %s4363_s1, 0 }
  0xeb   : > { %619 = sbr.rel (%p5419_p13) target bundleno = 2570 (0xa0a), region = 96 }
  0xf2   : > { %4185 = dma.done.wait (%p5420_p1), [#allocation3], 32   ;;  %p5421_p0 = pmov %p5420_p1 }
  0xf4   : > { %4187 = vsyncadd (%p5421_p0), [#allocation3], 4294967264  ;;  %p5422_p6 = pmov %p5421_p0 }
  0xf5   : > { %p5423_p5 = pmov %p5421_p0 }
  0xf6   : > { %4189 = dma.done.wait (%p5422_p6), [#allocation6], 48  }
  0xf7   : > { %4191 = vsyncadd (%p5423_p5), [#allocation6], 4294967248  ;;  %p5424_p9 = pmov %p5421_p0 }
  0xf8   : > { %p5425_p12 = pmov %p5421_p0 }
  0xf9   : > { %4193 = dma.done.wait (%p5424_p9), [#allocation9], 784  }
  0xfa   : > { %4195 = vsyncadd (%p5425_p12), [#allocation9], 4294966512  ;;  %p5426_p10 = pmov %p5421_p0 }
  0xfb   : > { %p5427_p2 = pmov %p5421_p0 }
  0xfc   : > { %4197 = dma.done.wait (%p5426_p10), [#allocation12], 1936  }
  0xfd   : > { %4199 = vsyncadd (%p5427_p2), [#allocation12], 4294965360  ;;  %p5428_p3 = pmov %p5421_p0 }
  0xfe   : > { %p5429_p4 = pmov %p5421_p0 }
  0xff   : > { %4201 = dma.done.wait (%p5428_p3), [#allocation15], 1664  }
 0x100   : > { %4203 = vsyncadd (%p5429_p4), [#allocation15], 4294965632  ;;  %p702_p7 = scmp.lt.s32.totalorder %s4363_s1, 1  ;;  %v4236_v0 = vmov 0   ;;  %v4237_v1 = vmov 0.0   ;;  %vm4238_vm0 = vmmov 0   ;;  %v739_v25 = vlaneseq }
 0x101   : > { %815 = vmatprep.mubr.bf16.mxu1 %v4236_v0  ;;  %3243 = vmatprep.subr.bf16.mxu0 %v4237_v1  ;;  %s5430_s19 = sld [smem:[#allocation32_spill]]  ;;  %s5431_s30 = sld [smem:[#allocation31_spill]]  ;;  %v3732_v9 = vld [vmem:[%s5362_s4] sm:$0xff]   ;;  %v3733_v11 = vld [vmem:[%s5362_s4 + $0x8] sm:$0xff]   ;;  %vm779_vm1 = vcmask 392192   ;;  %v3734_v13 = vld [vmem:[%s5362_s4 + $0x10] sm:$0xff]  }
 0x102   : > { %s703_s27 = scalar_select %p702_p7, %s4363_s1, 1  ;;  %3249 = vmatprep.mubr.msk.bf16.mxu0 %vm4238_vm0, %v4237_v1  ;;  %3244 = vmatpush3.bf16.msra.mxu0 %v3732_v9  ;;  %v3735_v14 = vld [vmem:[%s5362_s4 + $0x18] sm:$0xff]   ;;  %v3736_v16 = vld [vmem:[%s5362_s4 + $0x20] sm:$0xff]   ;;  %v3737_v20 = vld [vmem:[%s5362_s4 + $0x28] sm:$0xff]   ;;  %v4661_v26 = vshrl.u32 %v739_v25, 7  ;;  %vm830_vm2 = vcmask 261120  }
 0x103   : > { %3245 = vmatprep.subr.bf16.mxu0 %v4237_v1  ;;  %v3738_v21 = vld [vmem:[%s5362_s4 + $0x30] sm:$0xff]   ;;  %v3739_v23 = vld [vmem:[%s5362_s4 + $0x38] sm:$0xff]   ;;  %v3740_v24 = vld [vmem:[%s5362_s4 + $0x40] sm:$0xff]   ;;  %s5432_s28 = sld [smem:[#allocation34_spill]]  ;;  %v4239_v59 = vmov 0.0|0.0   ;;  %vm921_vm3 = vcmask 1040384  }
 0x104   : > { %s3142_s24 = sshll.u32 %s703_s27, 4  ;;  %v741_v27 = vsub.s32 0, %v4661_v26  ;;  %v716_v28 = vld [vmem:[#allocation2] sm:$0x3]  ;;  %v745_v29 = vsub.s32 1, %v4661_v26  ;;  %vm1365_vm4 = vcmask 916480  }
 0x105   : > { %vm1421_vm5 = vcmask 1045504   ;;  %vm1423_vm6 = vcmask 95232   ;;  %vm1416_vm7 = vcmask 97280   ;;  %vm1520_vm8 = vcmask 1043456   ;;  %s5433_s10 = sld [smem:[#allocation24_spill]]  ;;  %s5434_s0 = sld [smem:[#allocation29_spill]] }
 0x106   : > { %3246 = vmatpush3.bf16.msra.mxu0 %v3733_v11  ;;  %v742_v30 = vrot.slane %v716_v28, %v741_v27  ;;  %v746_v31 = vrot.slane %v716_v28, %v745_v29  ;;  %vm4240_vm9 = vmmov 1   ;;  %vm2014_vm11 = vcmask 785408   ;;  %s3139_s23 = sshll.u32 %s4363_s1, 4  ;;  %s5435_s7 = sld [smem:[#allocation38_spill]] }
 0x107   : > { %v3723_v2 = vld [vmem:[%s5430_s19 + $0x4] ss:$8 sps:$4 sm:$0xff]   ;;  %v3725_v3 = vld [vmem:[%s5430_s19] ss:$8 sps:$4 sm:$0xff]   ;;  %v3726_v4 = vld [vmem:[%s5430_s19 + $0x14] ss:$8 sps:$4 sm:$0xff]   ;;  %s706_s25 = scalar_lea.vmem %s5431_s30, %s3142_s24  ;;  %3247 = vmatprep.subr.bf16.mxu0 %v4237_v1 }
 0x108   : > { %783 = vmatprep.subr.bf16.mxu1 %v3723_v2  ;;  %v3728_v5 = vld [vmem:[%s5430_s19 + $0x10] ss:$8 sps:$4 sm:$0xff]   ;;  %v3729_v6 = vld [vmem:[%s5430_s19 + $0x24] ss:$8 sps:$4 sm:$0xff]   ;;  %v3731_v7 = vld [vmem:[%s5430_s19 + $0x20] ss:$8 sps:$4 sm:$0xff]  }
 0x109   : > { %784 = vmatpush1.bf16.msra.mxu1 %v3725_v3  ;;  %v708_v8 = vld [vmem:[%s706_s25] sm:$0xff]  ;;  %v709_v10 = vld [vmem:[%s706_s25 + $0x8] sm:$0xff]  ;;  %v719_v60 = vld [vmem:[%s5432_s28 + $0x10] sm:$0xff]  ;;  %vm2065_vm12 = vcmask 977920   ;;  %vm2061_vm13 = vcmask 982016   ;;  %vm2583_vm14 = vcmask 654336  }
 0x10a   : > { %785 = vmatprep.subr.bf16.mxu1 %v3726_v4  ;;  %v737_v12 = vpack.c.bf16 %v709_v10, %v708_v8  ;;  %3248 = vmatpush3.bf16.msra.mxu0 %v3734_v13  ;;  %v717_v56 = vld [vmem:[%s5432_s28] sm:$0xff]  ;;  %v718_v57 = vld [vmem:[%s5432_s28 + $0x8] sm:$0xff]  ;;  %v720_v61 = vld [vmem:[%s5432_s28 + $0x18] sm:$0xff]  ;;  %vm2634_vm15 = vcmask 812032   ;;  %s4241_s1 = smov [#allocation16]  }
 0x10b   : > { %3253 = vmatprep.subr.bf16.mxu0 %v4237_v1  ;;  %v3468_v58 = vpack.c.bf16 %v718_v57, %v717_v56  ;;  %v3471_v62 = vpack.c.bf16 %v720_v61, %v719_v60  ;;  %v721_v63 = vld [vmem:[%s5432_s28 + $0x20] sm:$0xff]  ;;  %v722_v2 = vld [vmem:[%s5432_s28 + $0x28] sm:$0xff]  ;;  %v723_v4 = vld [vmem:[%s5432_s28 + $0x30] sm:$0xff]  ;;  %s700_s2 = sand.u32 1, %s5433_s10   ;;  %p5436_p11 = scmp.ne.s32.totalorder %s5434_s0, 0 }
 0x10c   : > { %v1107_v15 = vshll.u32 %v737_v12, 16  ;;  %v1105_v17 = vshrl.u32 %v737_v12, 16  ;;  %v1183_v19 = vrot.slane %v737_v12, 1  ;;  %v3474_v3 = vpack.c.bf16 %v722_v2, %v721_v63  ;;  %v726_v8 = vld [vmem:[%s5432_s28 + $0x48] sm:$0xff]  ;;  %v727_v11 = vld [vmem:[%s5432_s28 + $0x50] sm:$0xff]  ;;  %vm3523_vm10 = vmpackc.low %vm1520_vm8, %vm4240_vm9  ;;  %s701_s30 = scalar_lea.vmem [#allocation16], %s700_s2  ;;  %s5316_s20 = scalar_lea.hbm %s5435_s7, %s3139_s23 }
 0x10d   : > { %786 = vmatpush1.bf16.msra.mxu1 %v3728_v5  ;;  %3250 = vmatmul.mubr.msk.bf16.vlgmr.msra.gmra.mrb[0].mxu0 %vm779_vm1, %v737_v12  ;;  %v724_v5 = vld [vmem:[%s5432_s28 + $0x38] sm:$0xff]  ;;  %v731_v28 = vld [vmem:[%s5432_s28 + $0x70] sm:$0xff]  ;;  %s2816_s25 = sshll.u32 %s701_s30, 4  ;;  %s2804_s27 = scalar_lea.sflag [#allocation4], %s700_s2  ;;  %s5318_s25 = int_to_ptr.vmem [resolvable:$true] %s2816_s25 }
 0x10e   : > { %787 = vmatprep.subr.bf16.mxu1 %v3729_v6  ;;  %v1109_v18 = vrot.slane %v1107_v15, 1  ;;  %3254 = vmatpush3.bf16.msra.mxu0 %v3735_v14  ;;  %v3477_v6 = vpack.c.bf16 %v724_v5, %v723_v4  ;;  %v2980_v14 = vld [vmem:[#allocation5] ss:$0 sm:$0xff]  ;;  %s4140_s22 = scalar_lea.vmem %s5318_s25, 16  ;;  %s4144_s3 = sshll.u32 %s4241_s1, 4  ;;  %s4145_s3 = int_to_ptr.vmem [resolvable:$false] %s4144_s3 }
 0x10f   : > { %3259 = vmatprep.mubr.msk.bf16.mxu0 %vm4238_vm0, %v4237_v1  ;;  %3255 = vmatprep.subr.bf16.mxu0 %v4237_v1  ;;  %p4141_p8 = scmp.ne.s32.totalorder %s5318_s25, %s4140_s22  ;;  %s4146_s5 = scalar_lea.vmem %s4145_s3, 32 }
 0x110   : > { %v1110_v22 = vor.u32 %v1109_v18, %v1105_v17  ;;  %p4147_p0 = scmp.lt.s32.totalorder %s5318_s25, %s4145_s3  ;;  %p4148_p6 = scmp.lt.s32.totalorder %s4146_s5, %s4140_s22 }
 0x111   : > { %788 = vmatpush1.bf16.msra.mxu1 %v3731_v7  ;;  %v725_v7 = vld [vmem:[%s5432_s28 + $0x40] sm:$0xff]  ;;  %p4142_p13 = pnand %p4141_p8, %p5436_p11 }
 0x112   : > { %3256 = vmatpush3.bf16.msra.mxu0 %v3736_v16  ;;  %3467 = vmatprep.subr.bf16.mxu1 %v4239_v59  ;;  %v3480_v10 = vpack.c.bf16 %v726_v8, %v725_v7  ;;  %p4149_p5 = por %p4148_p6, %p4147_p0 }
 0x113   : > { %3257 = vmatprep.subr.bf16.mxu0 %v4237_v1  ;;  %p4143_p1 = pneg %p4142_p13 }
 0x114   : > { %2978 = vmatmul.mubr.msk.bf16.vlgmr.msra.gmra.mrb[0].mxu1 %vm779_vm1, %v737_v12  ;;  %v728_v12 = vld [vmem:[%s5432_s28 + $0x58] sm:$0xff] }
 0x115   : > { %3469 = vmatpush1.bf16.msra.mxu1 %v3468_v58  ;;  %p4150_p9 = pnand %p4149_p5, %p4143_p1 }
 0x116   : > { %3258 = vmatpush3.bf16.msra.mxu0 %v3737_v20  ;;  %3470 = vmatprep.subr.bf16.mxu1 %v4239_v59  ;;  %v729_v20 = vld [vmem:[%s5432_s28 + $0x60] sm:$0xff] }
 0x117   : > { %3263 = vmatprep.subr.bf16.mxu0 %v4237_v1 }
 0x119   : > { %3260 = vmatmul.mubr.msk.bf16.vlgmr.msra.gmra.mrb[0].mxu0 %vm779_vm1, %v1110_v22  ;;  %3472 = vmatpush1.bf16.msra.mxu1 %v3471_v62 }
 0x11a   : > { %3264 = vmatpush3.bf16.msra.mxu0 %v3738_v21  ;;  %3269 = vmatprep.mubr.msk.bf16.mxu0 %vm4238_vm0, %v4237_v1  ;;  %v730_v21 = vld [vmem:[%s5432_s28 + $0x68] sm:$0xff] }
 0x11b   : > { %3265 = vmatprep.subr.bf16.mxu0 %v4237_v1  ;;  %3473 = vmatprep.subr.bf16.mxu1 %v4239_v59  ;;  %v3486_v25 = vpack.c.bf16 %v730_v21, %v729_v20 }
 0x11d   : > { %3475 = vmatpush1.bf16.msra.mxu1 %v3474_v3 }
 0x11e   : > { %3266 = vmatpush3.bf16.msra.mxu0 %v3739_v23  ;;  %3476 = vmatprep.subr.bf16.mxu1 %v4239_v59 }
 0x11f   : > { %3267 = vmatprep.subr.bf16.mxu0 %v4237_v1 }
 0x121   : > { %3478 = vmatpush1.bf16.msra.mxu1 %v3477_v6 }
 0x122   : > { %3268 = vmatpush3.bf16.msra.mxu0 %v3740_v24  ;;  %3479 = vmatprep.subr.bf16.mxu1 %v4239_v59 }
 0x123   : > { %3497 = vmatprep.subr.bf16.mxu0 %v4239_v59 }
 0x125   : > { %3270 = vmatmul.mubr.msk.bf16.vlgmr.msra.gmra.mrb[0].mxu0 %vm779_vm1, %v1183_v19  ;;  %3481 = vmatpush1.bf16.msra.mxu1 %v3480_v10  ;;  %v3483_v19 = vpack.c.bf16 %v728_v12, %v727_v11  ;;  %vm2638_vm1 = vcmask 1041408  }
 0x126   : > { %3482 = vmatprep.subr.bf16.mxu1 %v4239_v59 }
 0x129   : > { %3484 = vmatpush1.bf16.msra.mxu1 %v3483_v19 }
 0x12a   : > { %3485 = vmatprep.subr.bf16.mxu1 %v4239_v59 }
 0x12d   : > { %3487 = vmatpush1.bf16.msra.mxu1 %v3486_v25 }
 0x12e   : > { %3488 = vmatprep.subr.bf16.mxu1 %v4239_v59 }
 0x1e7   : > { %v817_v32 = vpop.f32.mrb[0].mxu1 }
 0x1e8   : > { %v818_v33 = vadd.f32 %v817_v32, %v742_v30  ;;  %v819_v34 = vpop.f32.mrb[1].mxu1  ;;  %v733_v32 = vld [vmem:[%s5432_s28 + $0x80] sm:$0xff] }
 0x1e9   : > { %v820_v35 = vadd.f32 %v819_v34, %v746_v31  ;;  %v821_v36 = vpop.f32.mrb[2].mxu1 }
 0x1ea   : > { %v4669_v37 = vmul.f32 2.0, %v818_v33  ;;  %v822_v38 = vadd.f32 %v821_v36, %v742_v30  ;;  %v823_v39 = vpop.f32.mrb[3].mxu1  ;;  %v732_v30 = vld [vmem:[%s5432_s28 + $0x78] sm:$0xff]  ;;  %v734_v33 = vld [vmem:[%s5432_s28 + $0x88] sm:$0xff] }
 0x1eb   : > { %v4671_v40 = vmul.f32 2.0, %v820_v35  ;;  %v824_v41 = vadd.f32 %v823_v39, %v746_v31  ;;  %v3489_v31 = vpack.c.bf16 %v732_v30, %v731_v28  ;;  %v3492_v34 = vpack.c.bf16 %v734_v33, %v733_v32  ;;  %v735_v35 = vld [vmem:[%s5432_s28 + $0x90] sm:$0xff]  ;;  %v736_v36 = vld [vmem:[%s5432_s28 + $0x98] sm:$0xff]  ;;  %v3743_v39 = vld [vmem:[%s5364_s6 + $0x4] ss:$8 sps:$4 sm:$0xff]  }
 0x1ec   : > { %v4678_v45 = vmul.f32 2.0, %v822_v38  ;;  %v846_v47 = vsub.f32 0.0, %v4669_v37  ;;  %v3495_v38 = vpack.c.bf16 %v736_v36, %v735_v35 }
 0x1ed   : > { %v4673_v42 = vmul.f32 2.0, %v824_v41  ;;  %v831_v43 = vsel %vm830_vm2, %v4671_v40, -inf  ;;  %v847_v44 = vsub.f32 0.0, %v4671_v40  ;;  %3490 = vmatpush1.bf16.msra.mxu1 %v3489_v31 }
 0x1ee   : > { %v832_v46 = vmax.f32 %v4669_v37, %v831_v43  ;;  %v848_v54 = vsub.f32 0.0, %v4678_v45  ;;  %3491 = vmatprep.subr.bf16.mxu1 %v4239_v59 }
 0x1ef   : > { %v850_v48 = vsel %vm830_vm2, %v847_v44, -inf  ;;  %v835_v49 = vsel %vm830_vm2, %v4673_v42, -inf  ;;  %v849_v50 = vsub.f32 0.0, %v4673_v42 }
 0x1f0   : > { %833 = vmax.xlane.f32.xlu0 %v832_v46  ;;  %v851_v51 = vmax.f32 %v846_v47, %v850_v48  ;;  %v836_v53 = vmax.f32 %v4678_v45, %v835_v49 }
 0x1f1   : > { %v854_v52 = vsel %vm830_vm2, %v849_v50, -inf  ;;  %3493 = vmatpush1.bf16.msra.mxu1 %v3492_v34 }
 0x1f2   : > { %852 = vmax.xlane.f32.xlu1 %v851_v51  ;;  %v855_v55 = vmax.f32 %v848_v54, %v854_v52  ;;  %3494 = vmatprep.subr.bf16.mxu1 %v4239_v59 }
 0x1f4   : > { %837 = vmax.xlane.f32.xlu0 %v836_v53 }
 0x1f5   : > { %3496 = vmatpush1.bf16.msra.mxu1 %v3495_v38 }
 0x1f6   : > { %856 = vmax.xlane.f32.xlu1 %v855_v55  ;;  %1369 = vmatprep.subr.bf16.mxu1 %v3743_v39 }
 0x1f8   : > { %v1239_v9 = vpop.f32.mrb[0].mxu0 }
 0x1f9   : > { %v3271_v13 = vpop.f32.mrb[1].mxu0  ;;  %v3564_v16 = vadd.f32 %v2980_v14, %v1239_v9 }
 0x1fa   : > { %v1242_v15 = vpop.f32.mrb[2].mxu0 }
 0x1fb   : > { %v3565_v17 = vadd.f32 %v2980_v14, %v1242_v15  ;;  %v3272_v18 = vpop.f32.mrb[3].mxu0  ;;  %v1248_v22 = vmax.f32 %v3564_v16, 0.0 }
 0x1fd   : > { %v1249_v23 = vmax.f32 %v3565_v17, 0.0 }
 0x1ff   : > { %v4746_v24 = vpack.c.bf16 %v1249_v23, %v1248_v22 }
 0x27d   : > { %v834_v41 = vpop.xlane.xlu0 %833 }
 0x27f   : > { %v853_v43 = vpop.xlane.xlu1 %852 }
 0x281   : > { %v838_v46 = vpop.xlane.xlu0 %837 }
 0x282   : > { %v839_v48 = vmax.f32 %v834_v41, %v838_v46 }
 0x283   : > { %v857_v49 = vpop.xlane.xlu1 %856 }
 0x284   : > { %v840_v51 = vrot.slane %v839_v48, 4  ;;  %v858_v52 = vmax.f32 %v853_v43, %v857_v49 }
 0x286   : > { %v841_v53 = vmax.f32 %v839_v48, %v840_v51  ;;  %v859_v55 = vrot.slane %v858_v52, 4 }
 0x288   : > { %v842_v56 = vrot.slane %v841_v53, 2  ;;  %v860_v57 = vmax.f32 %v858_v52, %v859_v55 }
 0x28a   : > { %v843_v58 = vmax.f32 %v841_v53, %v842_v56  ;;  %v861_v60 = vrot.slane %v860_v57, 2 }
 0x28c   : > { %v844_v61 = vrot.slane %v843_v58, 1  ;;  %v862_v62 = vmax.f32 %v860_v57, %v861_v60 }
 0x28e   : > { %v4773_v63 = vmax.f32 %v843_v58, %v844_v61  ;;  %v863_v2 = vrot.slane %v862_v62, 1 }
 0x290   : > { %v865_v3 = vsub.f32 %v4669_v37, %v4773_v63  ;;  %v866_v4 = vsub.f32 %v4671_v40, %v4773_v63  ;;  %v867_v5 = vsub.f32 %v4678_v45, %v4773_v63  ;;  %v868_v6 = vsub.f32 %v4673_v42, %v4773_v63 }
 0x291   : > { %v4783_v7 = vmax.f32 %v862_v62, %v863_v2 }
 0x292   : > { %v869_v8 = vmul.f32 1.442695, %v865_v3  ;;  %v871_v9 = vmul.f32 1.442695, %v866_v4  ;;  %v873_v10 = vmul.f32 1.442695, %v867_v5 }
 0x293   : > { %v875_v11 = vmul.f32 1.442695, %v868_v6  ;;  %v877_v12 = vsub.f32 %v846_v47, %v4783_v7  ;;  %v878_v13 = vsub.f32 %v847_v44, %v4783_v7  ;;  %v879_v14 = vsub.f32 %v848_v54, %v4783_v7  ;;  %v3741_v3 = vld [vmem:[%s5364_s6] ss:$8 sps:$4 sm:$0xff]   ;;  %v3746_v6 = vld [vmem:[%s5364_s6 + $0x14] ss:$8 sps:$4 sm:$0xff]  }
 0x294   : > { %3812 = vpow2.f32 %v869_v8  ;;  %v880_v15 = vsub.f32 %v849_v50, %v4783_v7 }
 0x295   : > { %3814 = vpow2.f32 %v871_v9  ;;  %v881_v16 = vmul.f32 1.442695, %v877_v12  ;;  %v883_v17 = vmul.f32 1.442695, %v878_v13  ;;  %v885_v18 = vmul.f32 1.442695, %v879_v14 }
 0x296   : > { %3816 = vpow2.f32 %v873_v10  ;;  %v887_v37 = vmul.f32 1.442695, %v880_v15  ;;  %v3744_v9 = vld [vmem:[%s5364_s6 + $0x10] ss:$8 sps:$4 sm:$0xff]   ;;  %v3749_v10 = vld [vmem:[%s5364_s6 + $0x24] ss:$8 sps:$4 sm:$0xff]  }
 0x297   : > { %3818 = vpow2.f32 %v875_v11  ;;  %v3747_v11 = vld [vmem:[%s5364_s6 + $0x20] ss:$8 sps:$4 sm:$0xff]   ;;  %v3752_v12 = vld [vmem:[%s5364_s6 + $0x34] ss:$8 sps:$4 sm:$0xff]   ;;  %v3755_v13 = vld [vmem:[%s5364_s6 + $0x44] ss:$8 sps:$4 sm:$0xff]  }
 0x298   : > { %3820 = vpow2.f32 %v881_v16  ;;  %v3753_v14 = vld [vmem:[%s5364_s6 + $0x40] ss:$8 sps:$4 sm:$0xff]   ;;  %v3758_v15 = vld [vmem:[%s5364_s6 + $0x54] ss:$8 sps:$4 sm:$0xff]   ;;  %v3756_v16 = vld [vmem:[%s5364_s6 + $0x50] ss:$8 sps:$4 sm:$0xff]  }
 0x299   : > { %3822 = vpow2.f32 %v883_v17  ;;  %v3761_v17 = vld [vmem:[%s5364_s6 + $0x64] ss:$8 sps:$4 sm:$0xff]  }
 0x29a   : > { %3824 = vpow2.f32 %v885_v18  ;;  %v3759_v18 = vld [vmem:[%s5364_s6 + $0x60] ss:$8 sps:$4 sm:$0xff]  }
 0x29b   : > { %3826 = vpow2.f32 %v887_v37  ;;  %v3762_v37 = vld [vmem:[%s5367_s9] sm:$0xff]  }
 0x29e   : > { %v3813_v40 = vpop.eup %3812 }
 0x29f   : > { %v3815_v44 = vpop.eup %3814 }
 0x2a0   : > { %v3817_v45 = vpop.eup %3816  ;;  %v896_v47 = vsel %vm830_vm2, %v3815_v44, 0.0  ;;  %v3764_v44 = vld [vmem:[%s5367_s9 + $0x10] sm:$0xff]  }
 0x2a1   : > { %v3819_v54 = vpop.eup %3818  ;;  %v889_v19 = vadd.f32 %v3817_v45, %v3813_v40  ;;  %v3763_v40 = vld [vmem:[%s5367_s9 + $0x8] sm:$0xff]   ;;  %v3765_v45 = vld [vmem:[%s5367_s9 + $0x18] sm:$0xff]  }
 0x2a2   : > { %v3821_v42 = vpop.eup %3820  ;;  %v897_v50 = vsel %vm830_vm2, %v3819_v54, 0.0  ;;  %v3767_v54 = vld [vmem:[%s5367_s9 + $0x28] sm:$0xff]  }
 0x2a3   : > { %v3823_v20 = vpop.eup %3822  ;;  %v898_v21 = vadd.f32 %v897_v50, %v896_v47  ;;  %v890_v22 = vrot.slane %v889_v19, 4  ;;  %v3766_v47 = vld [vmem:[%s5367_s9 + $0x20] sm:$0xff]  }
 0x2a4   : > { %v3825_v23 = vpop.eup %3824  ;;  %v912_v25 = vsel %vm830_vm2, %v3823_v20, 0.0  ;;  %v3770_v50 = vld [vmem:[%s5367_s9 + $0x40] sm:$0xff]   ;;  %v3771_v20 = vld [vmem:[%s5367_s9 + $0x48] sm:$0xff]  }
 0x2a5   : > { %v3827_v28 = vpop.eup %3826  ;;  %v899_v30 = vrot.slane %v898_v21, 4  ;;  %v891_v31 = vadd.f32 %v890_v22, %v889_v19  ;;  %v905_v32 = vadd.f32 %v3825_v23, %v3821_v42  ;;  %v3768_v19 = vld [vmem:[%s5367_s9 + $0x30] sm:$0xff]   ;;  %v3769_v42 = vld [vmem:[%s5367_s9 + $0x38] sm:$0xff]   ;;  %v3774_v23 = vld [vmem:[%s5367_s9 + $0x60] sm:$0xff]  }
 0x2a6   : > { %v913_v33 = vsel %vm830_vm2, %v3827_v28, 0.0  ;;  %v3773_v22 = vld [vmem:[%s5367_s9 + $0x58] sm:$0xff]   ;;  %v3775_v28 = vld [vmem:[%s5367_s9 + $0x68] sm:$0xff]  }
 0x2a7   : > { %v900_v34 = vadd.f32 %v899_v30, %v898_v21  ;;  %v914_v35 = vadd.f32 %v913_v33, %v912_v25  ;;  %v906_v36 = vrot.slane %v905_v32, 4  ;;  %v892_v38 = vrot.slane %v891_v31, 2  ;;  %v3772_v21 = vld [vmem:[%s5367_s9 + $0x50] sm:$0xff]  }
 0x2a8   : > { %v1744_v25 = vshll.u32 %v4746_v24, 16  ;;  %v1742_v30 = vshrl.u32 %v4746_v24, 16 }
 0x2a9   : > { %v901_v39 = vrot.slane %v900_v34, 2  ;;  %v915_v41 = vrot.slane %v914_v35, 4  ;;  %v907_v43 = vadd.f32 %v906_v36, %v905_v32  ;;  %v893_v51 = vadd.f32 %v892_v38, %v891_v31  ;;  %v3776_v32 = vld [vmem:[%s5367_s9 + $0x70] sm:$0xff]   ;;  %v3779_v36 = vld [vmem:[%s5367_s9 + $0x88] sm:$0xff]  }
 0x2aa   : > { %v1746_v31 = vrot.slane %v1744_v25, 1  ;;  %v3780_v38 = vld [vmem:[%s5367_s9 + $0x90] sm:$0xff]   ;;  %v1276_v25 = vld [vmem:[%s5366_s8 + $0x58] sm:$0xff] }
 0x2ab   : > { %v902_v46 = vadd.f32 %v901_v39, %v900_v34  ;;  %v916_v48 = vadd.f32 %v915_v41, %v914_v35  ;;  %v908_v49 = vrot.slane %v907_v43, 2  ;;  %v894_v58 = vrot.slane %v893_v51, 1  ;;  %v3777_v34 = vld [vmem:[%s5367_s9 + $0x78] sm:$0xff]   ;;  %v3778_v35 = vld [vmem:[%s5367_s9 + $0x80] sm:$0xff]  }
 0x2ac   : > { %v1747_v33 = vor.u32 %v1746_v31, %v1742_v30  ;;  %v3781_v39 = vld [vmem:[%s5367_s9 + $0x98] sm:$0xff]   ;;  %v3782_v41 = vld [vmem:[%s5367_s9 + $0xa0] sm:$0xff]   ;;  %v1278_v31 = vld [vmem:[%s5366_s8 + $0x68] sm:$0xff] }
 0x2ad   : > { %v917_v52 = vrot.slane %v916_v48, 2  ;;  %v909_v53 = vadd.f32 %v908_v49, %v907_v43  ;;  %v903_v55 = vrot.slane %v902_v46, 1  ;;  %v895_v4 = vadd.f32 %v894_v58, %v893_v51  ;;  %v1264_v49 = vld [vmem:[#allocation7] sm:$0x3] }
 0x2ae   : > { %v1852_v43 = vrot.slane %v4746_v24, 1  ;;  %v1292_v51 = vrot.slane %v1264_v49, %v745_v29  ;;  %v1277_v30 = vld [vmem:[%s5366_s8 + $0x60] sm:$0xff] }
 0x2af   : > { %v918_v56 = vadd.f32 %v917_v52, %v916_v48  ;;  %v910_v57 = vrot.slane %v909_v53, 1  ;;  %v904_v62 = vadd.f32 %v903_v55, %v902_v46 }
 0x2b1   : > { %v919_v60 = vrot.slane %v918_v56, 1  ;;  %v911_v61 = vadd.f32 %v910_v57, %v909_v53  ;;  %v1288_v53 = vrot.slane %v1264_v49, %v741_v27 }
 0x2b3   : > { %v920_v2 = vadd.f32 %v919_v60, %v918_v56  ;;  %v922_v8 = vsel %vm921_vm3, %v895_v4, %v911_v61 }
 0x2b5   : > { %v923_v5 = vsel %vm921_vm3, %v904_v62, %v920_v2 }
 0x2b6   : > { %2979 = vmatprep.mubr.msk.f32.mxu1 %vm830_vm2, %v923_v5  ;;  %vm2801_vm2 = vcmask 73728  }
 0x2b7   : > { %992 = vmatmul.mubr.f32.vlgmr.msra.gmra.mrb[4].mxu1 %v922_v8 }
 0x2b8   : > { %1370 = vmatpush1.bf16.msra.mxu1 %v3741_v3  ;;  %1401 = vmatprep.mubr.bf16.mxu1 %v4236_v0  ;;  %v3750_v0 = vld [vmem:[%s5364_s6 + $0x30] ss:$8 sps:$4 sm:$0xff]  }
 0x2b9   : > { %1371 = vmatprep.subr.bf16.mxu1 %v3746_v6 }
 0x2bc   : > { %1372 = vmatpush1.bf16.msra.mxu1 %v3744_v9 }
 0x2bd   : > { %1373 = vmatprep.subr.bf16.mxu1 %v3749_v10 }
 0x2c0   : > { %1374 = vmatpush1.bf16.msra.mxu1 %v3747_v11 }
 0x2c1   : > { %1375 = vmatprep.subr.bf16.mxu1 %v3752_v12 }
 0x2c4   : > { %1376 = vmatpush1.bf16.msra.mxu1 %v3750_v0 }
 0x2c5   : > { %1377 = vmatprep.subr.bf16.mxu1 %v3755_v13 }
 0x2c8   : > { %1378 = vmatpush1.bf16.msra.mxu1 %v3753_v14 }
 0x2c9   : > { %1379 = vmatprep.subr.bf16.mxu1 %v3758_v15 }
 0x2cc   : > { %1380 = vmatpush1.bf16.msra.mxu1 %v3756_v16  ;;  %v1265_v16 = vld [vmem:[%s5366_s8] sm:$0xff] }
 0x2cd   : > { %1381 = vmatprep.subr.bf16.mxu1 %v3761_v17  ;;  %v1266_v17 = vld [vmem:[%s5366_s8 + $0x8] sm:$0xff] }
 0x2d0   : > { %1382 = vmatpush1.bf16.msra.mxu1 %v3759_v18  ;;  %v3498_v18 = vpack.c.bf16 %v1266_v17, %v1265_v16 }
 0x2d1   : > { %3273 = vmatprep.subr.bf16.mxu1 %v4237_v1 }
 0x2d2   : > { %3499 = vmatpush1.bf16.msra.mxu0 %v3498_v18 }
 0x2d3   : > { %3019 = vmatmul.mubr.msk.bf16.vlgmr.msra.gmra.mrb[8].mxu1 %vm1365_vm4, %v4746_v24  ;;  %3500 = vmatprep.subr.bf16.mxu0 %v4239_v59 }
 0x2d4   : > { %3274 = vmatpush3.bf16.msra.mxu1 %v3762_v37  ;;  %3287 = vmatprep.mubr.msk.bf16.mxu1 %vm4238_vm0, %v4237_v1  ;;  %v1267_v37 = vld [vmem:[%s5366_s8 + $0x10] sm:$0xff] }
 0x2d5   : > { %3275 = vmatprep.subr.bf16.mxu1 %v4237_v1 }
 0x2d8   : > { %3276 = vmatpush3.bf16.msra.mxu1 %v3763_v40  ;;  %v1268_v40 = vld [vmem:[%s5366_s8 + $0x18] sm:$0xff] }
 0x2d9   : > { %3277 = vmatprep.subr.bf16.mxu1 %v4237_v1 }
 0x2dc   : > { %3278 = vmatpush3.bf16.msra.mxu1 %v3764_v44  ;;  %v3501_v44 = vpack.c.bf16 %v1268_v40, %v1267_v37 }
 0x2dd   : > { %3279 = vmatprep.subr.bf16.mxu1 %v4237_v1 }
 0x2de   : > { %3502 = vmatpush1.bf16.msra.mxu0 %v3501_v44 }
 0x2df   : > { %3503 = vmatprep.subr.bf16.mxu0 %v4239_v59 }
 0x2e0   : > { %3280 = vmatpush3.bf16.msra.mxu1 %v3765_v45  ;;  %v1269_v45 = vld [vmem:[%s5366_s8 + $0x20] sm:$0xff] }
 0x2e1   : > { %3281 = vmatprep.subr.bf16.mxu1 %v4237_v1 }
 0x2e4   : > { %3282 = vmatpush3.bf16.msra.mxu1 %v3766_v47  ;;  %v1270_v47 = vld [vmem:[%s5366_s8 + $0x28] sm:$0xff] }
 0x2e5   : > { %3283 = vmatprep.subr.bf16.mxu1 %v4237_v1 }
 0x2e8   : > { %3284 = vmatpush3.bf16.msra.mxu1 %v3767_v54  ;;  %v3504_v54 = vpack.c.bf16 %v1270_v47, %v1269_v45 }
 0x2e9   : > { %3285 = vmatprep.subr.bf16.mxu1 %v4237_v1 }
 0x2ea   : > { %3505 = vmatpush1.bf16.msra.mxu0 %v3504_v54 }
 0x2eb   : > { %3506 = vmatprep.subr.bf16.mxu0 %v4239_v59 }
 0x2ec   : > { %3286 = vmatpush3.bf16.msra.mxu1 %v3768_v19  ;;  %v1271_v19 = vld [vmem:[%s5366_s8 + $0x30] sm:$0xff] }
 0x2ed   : > { %3291 = vmatprep.subr.bf16.mxu1 %v4237_v1 }
 0x2ef   : > { %3288 = vmatmul.mubr.msk.bf16.vlgmr.msra.gmra.mrb[12].mxu1 %vm1365_vm4, %v4746_v24 }
 0x2f0   : > { %3292 = vmatpush3.bf16.msra.mxu1 %v3769_v42  ;;  %3305 = vmatprep.mubr.msk.bf16.mxu1 %vm4238_vm0, %v4237_v1  ;;  %v1272_v42 = vld [vmem:[%s5366_s8 + $0x38] sm:$0xff] }
 0x2f1   : > { %3293 = vmatprep.subr.bf16.mxu1 %v4237_v1 }
 0x2f4   : > { %3294 = vmatpush3.bf16.msra.mxu1 %v3770_v50  ;;  %v3507_v50 = vpack.c.bf16 %v1272_v42, %v1271_v19 }
 0x2f5   : > { %3295 = vmatprep.subr.bf16.mxu1 %v4237_v1 }
 0x2f6   : > { %3508 = vmatpush1.bf16.msra.mxu0 %v3507_v50 }
 0x2f7   : > { %3509 = vmatprep.subr.bf16.mxu0 %v4239_v59 }
 0x2f8   : > { %3296 = vmatpush3.bf16.msra.mxu1 %v3771_v20  ;;  %v1273_v20 = vld [vmem:[%s5366_s8 + $0x40] sm:$0xff] }
 0x2f9   : > { %3297 = vmatprep.subr.bf16.mxu1 %v4237_v1 }
 0x2fc   : > { %3298 = vmatpush3.bf16.msra.mxu1 %v3772_v21  ;;  %v1274_v21 = vld [vmem:[%s5366_s8 + $0x48] sm:$0xff] }
 0x2fd   : > { %3299 = vmatprep.subr.bf16.mxu1 %v4237_v1 }
 0x300   : > { %3300 = vmatpush3.bf16.msra.mxu1 %v3773_v22  ;;  %v3510_v22 = vpack.c.bf16 %v1274_v21, %v1273_v20 }
 0x301   : > { %3301 = vmatprep.subr.bf16.mxu1 %v4237_v1 }
 0x302   : > { %3511 = vmatpush1.bf16.msra.mxu0 %v3510_v22 }
 0x303   : > { %3512 = vmatprep.subr.bf16.mxu0 %v4239_v59 }
 0x304   : > { %3302 = vmatpush3.bf16.msra.mxu1 %v3774_v23  ;;  %v1275_v23 = vld [vmem:[%s5366_s8 + $0x50] sm:$0xff] }
 0x305   : > { %3303 = vmatprep.subr.bf16.mxu1 %v4237_v1 }
 0x308   : > { %3304 = vmatpush3.bf16.msra.mxu1 %v3775_v28  ;;  %v3513_v28 = vpack.c.bf16 %v1276_v25, %v1275_v23 }
 0x309   : > { %3309 = vmatprep.subr.bf16.mxu1 %v4237_v1 }
 0x30a   : > { %3514 = vmatpush1.bf16.msra.mxu0 %v3513_v28 }
 0x30b   : > { %3306 = vmatmul.mubr.msk.bf16.vlgmr.msra.gmra.mrb[12].mxu1 %vm1365_vm4, %v1747_v33  ;;  %3515 = vmatprep.subr.bf16.mxu0 %v4239_v59  ;;  %v1279_v33 = vld [vmem:[%s5366_s8 + $0x70] sm:$0xff] }
 0x30c   : > { %3310 = vmatpush3.bf16.msra.mxu1 %v3776_v32  ;;  %3323 = vmatprep.mubr.msk.bf16.mxu1 %vm4238_vm0, %v4237_v1  ;;  %v3516_v32 = vpack.c.bf16 %v1278_v31, %v1277_v30 }
 0x30d   : > { %3311 = vmatprep.subr.bf16.mxu1 %v4237_v1 }
 0x30e   : > { %3517 = vmatpush1.bf16.msra.mxu0 %v3516_v32 }
 0x30f   : > { %3518 = vmatprep.subr.bf16.mxu0 %v4239_v59 }
 0x310   : > { %3312 = vmatpush3.bf16.msra.mxu1 %v3777_v34  ;;  %v1280_v34 = vld [vmem:[%s5366_s8 + $0x78] sm:$0xff] }
 0x311   : > { %3313 = vmatprep.subr.bf16.mxu1 %v4237_v1 }
 0x314   : > { %3314 = vmatpush3.bf16.msra.mxu1 %v3778_v35  ;;  %v3519_v35 = vpack.c.bf16 %v1280_v34, %v1279_v33 }
 0x315   : > { %3315 = vmatprep.subr.bf16.mxu1 %v4237_v1 }
 0x316   : > { %3520 = vmatpush1.bf16.msra.mxu0 %v3519_v35 }
 0x317   : > { %3521 = vmatprep.subr.bf16.mxu0 %v4239_v59 }
 0x318   : > { %3316 = vmatpush3.bf16.msra.mxu1 %v3779_v36  ;;  %v1281_v36 = vld [vmem:[%s5366_s8 + $0x80] sm:$0xff] }
 0x319   : > { %3317 = vmatprep.subr.bf16.mxu1 %v4237_v1 }
 0x31c   : > { %3318 = vmatpush3.bf16.msra.mxu1 %v3780_v38  ;;  %v1282_v38 = vld [vmem:[%s5366_s8 + $0x88] sm:$0xf] }
 0x31d   : > { %3319 = vmatprep.subr.bf16.mxu1 %v4237_v1 }
 0x320   : > { %3320 = vmatpush3.bf16.msra.mxu1 %v3781_v39  ;;  %v3522_v39 = vpack.c.bf16 %v1282_v38, %v1281_v36 }
 0x321   : > { %3321 = vmatprep.subr.bf16.mxu1 %v4237_v1 }
 0x322   : > { %3524 = vmatpush1.bf16.msk.msra.mxu0 %vm3523_vm10, %v3522_v39 }
 0x323   : > { %3327 = vmatprep.subr.bf16.mxu0 %v4237_v1 }
 0x324   : > { %3322 = vmatpush3.bf16.msra.mxu1 %v3782_v41  ;;  %v3022_v41 = vld [vmem:[#allocation8] ss:$0 sm:$0xff] }
 0x325   : > { %3424 = vmatprep.subr.bf16.mxu1 %v4237_v1 }
 0x327   : > { %3324 = vmatmul.mubr.msk.bf16.vlgmr.msra.gmra.mrb[12].mxu1 %vm1365_vm4, %v1852_v43 }
 0x328   : > { %3434 = vmatprep.mubr.msk.bf16.mxu1 %vm4238_vm0, %v4237_v1 }
 0x38a   : > { %v4946_v46 = vpop.f32.mrb[4].mxu1 }
 0x38b   : > { %v995_v48 = vpop.f32.mrb[5].mxu1 }
 0x3a6   : > { %v1403_v52 = vpop.f32.mrb[8].mxu1 }
 0x3a7   : > { %v1405_v55 = vpop.f32.mrb[9].mxu1  ;;  %v1404_v62 = vadd.f32 %v1403_v52, %v1288_v53 }
 0x3a8   : > { %v1406_v24 = vadd.f32 %v1405_v55, %v1292_v51  ;;  %v1407_v56 = vpop.f32.mrb[10].mxu1 }
 0x3a9   : > { %v1408_v57 = vadd.f32 %v1407_v56, %v1288_v53  ;;  %v1409_v58 = vpop.f32.mrb[11].mxu1  ;;  %v4965_v6 = vmul.f32 2.0, %v1404_v62 }
 0x3aa   : > { %v4952_v60 = vmul.f32 2.0, %v1406_v24  ;;  %v1410_v61 = vadd.f32 %v1409_v58, %v1292_v51 }
 0x3ab   : > { %v4954_v2 = vmul.f32 2.0, %v1408_v57  ;;  %v1436_v14 = vsub.f32 0.0, %v4965_v6 }
 0x3ac   : > { %v4956_v3 = vmul.f32 2.0, %v1410_v61  ;;  %v1437_v5 = vsub.f32 0.0, %v4952_v60  ;;  %v1417_v11 = vsel %vm1416_vm7, %v4952_v60, -inf }
 0x3ad   : > { %v1422_v29 = vsel %vm1421_vm5, %v4954_v2, -inf  ;;  %v1438_v26 = vsub.f32 0.0, %v4954_v2  ;;  %v1418_v13 = vmax.f32 %v4965_v6, %v1417_v11 }
 0x3ae   : > { %v1424_v27 = vsel %vm1423_vm6, %v4956_v3, -inf  ;;  %v1439_v4 = vsub.f32 0.0, %v4956_v3  ;;  %v1440_v0 = vsel %vm1416_vm7, %v1437_v5, -inf }
 0x3af   : > { %v1425_v8 = vmax.f32 %v1422_v29, %v1424_v27  ;;  %v1444_v9 = vsel %vm1421_vm5, %v1438_v26, -inf  ;;  %v1441_v15 = vmax.f32 %v1436_v14, %v1440_v0 }
 0x3b0   : > { %v1445_v10 = vsel %vm1423_vm6, %v1439_v4, -inf }
 0x3b1   : > { %1426 = vmax.xlane.f32.xlu0 %v1425_v8  ;;  %v1446_v12 = vmax.f32 %v1444_v9, %v1445_v10 }
 0x3b3   : > { %1447 = vmax.xlane.f32.xlu1 %v1446_v12 }
 0x3b5   : > { %1419 = vmax.xlane.f32.xlu0 %v1418_v13 }
 0x3b7   : > { %1442 = vmax.xlane.f32.xlu1 %v1441_v15 }
 0x3fa   : > { %v1932_v43 = vpop.f32.mrb[12].mxu1 }
 0x3fb   : > { %v3566_v48 = vadd.f32 %v3022_v41, %v1932_v43  ;;  %v3325_v49 = vpop.f32.mrb[13].mxu1 }
 0x3fc   : > { %v1935_v51 = vpop.f32.mrb[14].mxu1 }
 0x3fd   : > { %v3567_v52 = vadd.f32 %v3022_v41, %v1935_v51  ;;  %v3326_v53 = vpop.f32.mrb[15].mxu1  ;;  %v1941_v55 = vmax.f32 %v3566_v48, 0.0 }
 0x3ff   : > { %v1942_v24 = vmax.f32 %v3567_v52, 0.0 }
 0x401   : > { %v5046_v56 = vpack.c.bf16 %v1942_v24, %v1941_v55 }
 0x43e   : > { %v1427_v57 = vpop.xlane.xlu0 %1426 }
 0x43f   : > { %v1428_v61 = vsel %vm1421_vm5, %v1427_v57, -inf }
 0x440   : > { %v1448_v58 = vpop.xlane.xlu1 %1447 }
 0x441   : > { %v1449_v27 = vsel %vm1421_vm5, %v1448_v58, -inf }
 0x442   : > { %v1420_v62 = vpop.xlane.xlu0 %1419 }
 0x443   : > { %v1429_v29 = vmax.f32 %v1420_v62, %v1428_v61 }
 0x444   : > { %v1443_v8 = vpop.xlane.xlu1 %1442 }
 0x445   : > { %v1430_v9 = vrot.slane %v1429_v29, 4  ;;  %v1450_v10 = vmax.f32 %v1443_v8, %v1449_v27 }
 0x447   : > { %v1431_v11 = vmax.f32 %v1429_v29, %v1430_v9  ;;  %v1451_v12 = vrot.slane %v1450_v10, 4 }
 0x449   : > { %v1432_v0 = vrot.slane %v1431_v11, 2  ;;  %v1452_v13 = vmax.f32 %v1450_v10, %v1451_v12 }
 0x44b   : > { %v1433_v15 = vmax.f32 %v1431_v11, %v1432_v0  ;;  %v1453_v16 = vrot.slane %v1452_v13, 2 }
 0x44d   : > { %v1434_v17 = vrot.slane %v1433_v15, 1  ;;  %v1454_v18 = vmax.f32 %v1452_v13, %v1453_v16 }
 0x44f   : > { %v5050_v37 = vmax.f32 %v1433_v15, %v1434_v17  ;;  %v1455_v40 = vrot.slane %v1454_v18, 1 }
 0x451   : > { %v1457_v44 = vsub.f32 %v4965_v6, %v5050_v37  ;;  %v1458_v45 = vsub.f32 %v4952_v60, %v5050_v37  ;;  %v1459_v47 = vsub.f32 %v4954_v2, %v5050_v37  ;;  %v1460_v54 = vsub.f32 %v4956_v3, %v5050_v37 }
 0x452   : > { %v5060_v19 = vmax.f32 %v1454_v18, %v1455_v40 }
 0x453   : > { %v1461_v42 = vmul.f32 1.442695, %v1457_v44  ;;  %v1463_v50 = vmul.f32 1.442695, %v1458_v45  ;;  %v1465_v20 = vmul.f32 1.442695, %v1459_v47 }
 0x454   : > { %v1467_v21 = vmul.f32 1.442695, %v1460_v54  ;;  %v1469_v22 = vsub.f32 %v1436_v14, %v5060_v19  ;;  %v1470_v23 = vsub.f32 %v1437_v5, %v5060_v19  ;;  %v1471_v25 = vsub.f32 %v1438_v26, %v5060_v19  ;;  %v3783_v54 = vld [vmem:[#allocation10] sm:$0xff]  }
 0x455   : > { %3828 = vpow2.f32 %v1461_v42  ;;  %v1472_v28 = vsub.f32 %v1439_v4, %v5060_v19 }
 0x456   : > { %3830 = vpow2.f32 %v1463_v50  ;;  %v1473_v30 = vmul.f32 1.442695, %v1469_v22  ;;  %v1475_v31 = vmul.f32 1.442695, %v1470_v23  ;;  %v1477_v32 = vmul.f32 1.442695, %v1471_v25 }
 0x457   : > { %3832 = vpow2.f32 %v1465_v20  ;;  %v1479_v6 = vmul.f32 1.442695, %v1472_v28  ;;  %v3784_v50 = vld [vmem:[#allocation10 + $0x8] sm:$0xff]   ;;  %v3785_v20 = vld [vmem:[#allocation10 + $0x10] sm:$0xff]   ;;  %v3787_v22 = vld [vmem:[#allocation10 + $0x20] sm:$0xff]  }
 0x458   : > { %3834 = vpow2.f32 %v1467_v21  ;;  %v3786_v21 = vld [vmem:[#allocation10 + $0x18] sm:$0xff]   ;;  %v3788_v23 = vld [vmem:[#allocation10 + $0x28] sm:$0xff]  }
 0x459   : > { %3836 = vpow2.f32 %v1473_v30 }
 0x45a   : > { %3838 = vpow2.f32 %v1475_v31 }
 0x45b   : > { %3840 = vpow2.f32 %v1477_v32 }
 0x45c   : > { %3842 = vpow2.f32 %v1479_v6 }
 0x45d   : > { %3844 = vlog2.f32 %v4946_v46 }
 0x45f   : > { %v3829_v60 = vpop.eup %3828 }
 0x460   : > { %v3831_v5 = vpop.eup %3830 }
 0x461   : > { %v3833_v2 = vpop.eup %3832  ;;  %v1489_v26 = vsel %vm1416_vm7, %v3831_v5, 0.0 }
 0x462   : > { %v3835_v14 = vpop.eup %3834  ;;  %v1481_v3 = vsel %vm1421_vm5, %v3833_v2, 0.0 }
 0x463   : > { %v3837_v4 = vpop.eup %3836  ;;  %v1490_v33 = vsel %vm1423_vm6, %v3835_v14, 0.0  ;;  %v1482_v34 = vadd.f32 %v3829_v60, %v1481_v3 }
 0x464   : > { %v3839_v35 = vpop.eup %3838  ;;  %v1491_v36 = vadd.f32 %v1490_v33, %v1489_v26 }
 0x465   : > { %v3841_v38 = vpop.eup %3840  ;;  %v1506_v39 = vsel %vm1416_vm7, %v3839_v35, 0.0  ;;  %v1483_v41 = vrot.slane %v1482_v34, 4 }
 0x466   : > { %v3843_v43 = vpop.eup %3842  ;;  %v1492_v48 = vrot.slane %v1491_v36, 4  ;;  %v1498_v49 = vsel %vm1421_vm5, %v3841_v38, 0.0 }
 0x467   : > { %v1507_v51 = vsel %vm1423_vm6, %v3843_v43, 0.0  ;;  %v1484_v52 = vadd.f32 %v1483_v41, %v1482_v34  ;;  %v1499_v53 = vadd.f32 %v3837_v4, %v1498_v49  ;;  %v3845_v25 = vpop.eup %3844 }
 0x468   : > { %v1493_v55 = vadd.f32 %v1492_v48, %v1491_v36  ;;  %v1508_v24 = vadd.f32 %v1507_v51, %v1506_v39  ;;  %v998_v28 = vmul.f32 0.6931472, %v3845_v25 }
 0x469   : > { %v1485_v57 = vrot.slane %v1484_v52, 2  ;;  %v1500_v58 = vrot.slane %v1499_v53, 4 }
 0x46a   : > { %v1494_v61 = vrot.slane %v1493_v55, 2  ;;  %v1509_v62 = vrot.slane %v1508_v24, 4  ;;  %v999_v30 = vadd.f32 %v998_v28, %v4773_v63  ;;  %v1000_v31 = vadd.f32 %v998_v28, %v4783_v7 }
 0x46b   : > { %v1486_v29 = vadd.f32 %v1485_v57, %v1484_v52  ;;  %v1501_v27 = vadd.f32 %v1500_v58, %v1499_v53 }
 0x46c   : > { %v1495_v8 = vadd.f32 %v1494_v61, %v1493_v55  ;;  %v1510_v9 = vadd.f32 %v1509_v62, %v1508_v24  ;;  %v1001_v32 = vmax.f32 %v999_v30, 0.0  ;;  %v1012_v6 = vmax.f32 %v1000_v31, 0.0 }
 0x46d   : > { %v1502_v10 = vrot.slane %v1501_v27, 2  ;;  %v1487_v12 = vrot.slane %v1486_v29, 1 }
 0x46e   : > { %v1511_v11 = vrot.slane %v1510_v9, 2  ;;  %v1496_v13 = vrot.slane %v1495_v8, 1  ;;  %v1002_v60 = vsub.f32 0.0, %v1001_v32  ;;  %v1005_v5 = vsub.f32 %v999_v30, %v1001_v32 }
 0x46f   : > { %v1503_v0 = vadd.f32 %v1502_v10, %v1501_v27  ;;  %v1488_v18 = vadd.f32 %v1487_v12, %v1486_v29  ;;  %v1013_v2 = vsub.f32 0.0, %v1012_v6  ;;  %v1016_v26 = vsub.f32 %v1000_v31, %v1012_v6 }
 0x470   : > { %v1512_v15 = vadd.f32 %v1511_v11, %v1510_v9  ;;  %v1497_v44 = vadd.f32 %v1496_v13, %v1495_v8  ;;  %v1003_v14 = vmul.f32 1.442695, %v1002_v60  ;;  %v1006_v3 = vmul.f32 1.442695, %v1005_v5 }
 0x471   : > { %v1504_v16 = vrot.slane %v1503_v0, 1  ;;  %v1014_v4 = vmul.f32 1.442695, %v1013_v2  ;;  %v1017_v33 = vmul.f32 1.442695, %v1016_v26  ;;  %v1956_v2 = vld [vmem:[#allocation13] sm:$0xff] }
 0x472   : > { %v1513_v17 = vrot.slane %v1512_v15, 1  ;;  %3846 = vpow2.f32 %v1003_v14  ;;  %v1957_v26 = vld [vmem:[#allocation13 + $0x8] sm:$0xff] }
 0x473   : > { %v1505_v40 = vadd.f32 %v1504_v16, %v1503_v0  ;;  %3848 = vpow2.f32 %v1006_v3  ;;  %v3075_v0 = vld [vmem:[#allocation11] ss:$0 sm:$0xff]  ;;  %v3526_v14 = vpack.c.bf16 %v1957_v26, %v1956_v2  ;;  %v1958_v3 = vld [vmem:[#allocation13 + $0x10] sm:$0xff] }
 0x474   : > { %v1514_v45 = vadd.f32 %v1513_v17, %v1512_v15  ;;  %3850 = vpow2.f32 %v1014_v4  ;;  %v1959_v4 = vld [vmem:[#allocation13 + $0x18] sm:$0xff] }
 0x475   : > { %v1515_v47 = vsel %vm921_vm3, %v1488_v18, %v1505_v40  ;;  %3852 = vpow2.f32 %v1017_v33  ;;  %v3529_v33 = vpack.c.bf16 %v1959_v4, %v1958_v3 }
 0x476   : > { %v1516_v42 = vsel %vm921_vm3, %v1497_v44, %v1514_v45 }
 0x477   : > { %3021 = vmatprep.mubr.msk.f32.mxu0 %vm1416_vm7, %v1516_v42 }
 0x478   : > { %1589 = vmatmul.mubr.f32.vlgmr.msra.gmra.mrb[4].mxu0 %v1515_v47 }
 0x479   : > { %3328 = vmatpush3.bf16.msra.mxu0 %v3783_v54  ;;  %3339 = vmatprep.mubr.msk.bf16.mxu0 %vm4238_vm0, %v4237_v1 }
 0x47a   : > { %3329 = vmatprep.subr.bf16.mxu0 %v4237_v1 }
 0x47c   : > { %v3847_v46 = vpop.eup %3846 }
 0x47d   : > { %3330 = vmatpush3.bf16.msra.mxu0 %v3784_v50  ;;  %v3849_v34 = vpop.eup %3848 }
 0x47e   : > { %3331 = vmatprep.subr.bf16.mxu0 %v4237_v1  ;;  %v3851_v35 = vpop.eup %3850  ;;  %v1008_v36 = vadd.f32 %v3849_v34, %v3847_v46  ;;  %v1960_v46 = vld [vmem:[#allocation13 + $0x20] sm:$0xff]  ;;  %v1961_v34 = vld [vmem:[#allocation13 + $0x28] sm:$0xff] }
 0x47f   : > { %v3853_v63 = vpop.eup %3852 }
 0x480   : > { %v1019_v7 = vadd.f32 %v3853_v63, %v3851_v35  ;;  %3854 = vlog2.f32 %v1008_v36  ;;  %v3532_v35 = vpack.c.bf16 %v1961_v34, %v1960_v46  ;;  %v1962_v63 = vld [vmem:[#allocation13 + $0x30] sm:$0xff]  ;;  %v1963_v36 = vld [vmem:[#allocation13 + $0x38] sm:$0xff] }
 0x481   : > { %3332 = vmatpush3.bf16.msra.mxu0 %v3785_v20 }
 0x482   : > { %3333 = vmatprep.subr.bf16.mxu0 %v4237_v1  ;;  %3856 = vlog2.f32 %v1019_v7  ;;  %v3535_v7 = vpack.c.bf16 %v1963_v36, %v1962_v63 }
 0x485   : > { %3334 = vmatpush3.bf16.msra.mxu0 %v3786_v21 }
 0x486   : > { %3335 = vmatprep.subr.bf16.mxu0 %v4237_v1 }
 0x489   : > { %3336 = vmatpush3.bf16.msra.mxu0 %v3787_v22 }
 0x48a   : > { %3337 = vmatprep.subr.bf16.mxu0 %v4237_v1  ;;  %v3855_v41 = vpop.eup %3854 }
 0x48b   : > { %v1010_v48 = vmul.f32 0.6931472, %v3855_v41 }
 0x48c   : > { %v3857_v43 = vpop.eup %3856 }
 0x48d   : > { %3338 = vmatpush3.bf16.msra.mxu0 %v3788_v23  ;;  %v1021_v49 = vmul.f32 0.6931472, %v3857_v43  ;;  %v1011_v53 = vadd.f32 %v1010_v48, %v1001_v32  ;;  %v1966_v43 = vld [vmem:[#allocation13 + $0x50] sm:$0xff]  ;;  %v1967_v48 = vld [vmem:[#allocation13 + $0x58] sm:$0xff] }
 0x48e   : > { %3525 = vmatprep.subr.bf16.mxu0 %v4239_v59 }
 0x48f   : > { %v1022_v55 = vadd.f32 %v1021_v49, %v1012_v6  ;;  %v3541_v49 = vpack.c.bf16 %v1967_v48, %v1966_v43  ;;  %v3790_v43 = vld [vmem:[%s5372_s14 + $0x8] sm:$0xff]   ;;  %v3791_v48 = vld [vmem:[%s5372_s14 + $0x10] sm:$0xff]  }
 0x490   : > { %3340 = vmatmul.mubr.msk.bf16.vlgmr.msra.gmra.mrb[8].mxu0 %vm2014_vm11, %v5046_v56 }
 0x491   : > { %3373 = vmatprep.mubr.msk.f32.mxu0 %vm4238_vm0, %v4237_v1  ;;  %3527 = vmatpush3.bf16.msra.mxu0 %v3526_v14 }
 0x492   : > { %3528 = vmatprep.subr.bf16.mxu0 %v4239_v59 }
 0x495   : > { %3530 = vmatpush3.bf16.msra.mxu0 %v3529_v33 }
 0x496   : > { %3531 = vmatprep.subr.bf16.mxu0 %v4239_v59 }
 0x499   : > { %3533 = vmatpush3.bf16.msra.mxu0 %v3532_v35 }
 0x49a   : > { %3534 = vmatprep.subr.bf16.mxu0 %v4239_v59 }
 0x49d   : > { %3536 = vmatpush3.bf16.msra.mxu0 %v3535_v7 }
 0x49e   : > { %3537 = vmatprep.subr.bf16.mxu0 %v4239_v59 }
 0x54b   : > { %v1590_v38 = vpop.f32.mrb[4].mxu0 }
 0x54c   : > { %3858 = vlog2.f32 %v1590_v38  ;;  %v1592_v39 = vpop.f32.mrb[5].mxu0  ;;  %v1964_v38 = vld [vmem:[#allocation13 + $0x40] sm:$0xff] }
 0x54d   : > { %v1965_v39 = vld [vmem:[#allocation13 + $0x48] sm:$0xff] }
 0x54e   : > { %v3538_v41 = vpack.c.bf16 %v1965_v39, %v1964_v38  ;;  %v3789_v39 = vld [vmem:[%s5372_s14] sm:$0xff]  }
 0x550   : > { %3539 = vmatpush3.bf16.msra.mxu0 %v3538_v41 }
 0x551   : > { %3540 = vmatprep.subr.bf16.mxu0 %v4239_v59 }
 0x554   : > { %3542 = vmatpush3.bf16.msra.mxu0 %v3541_v49  ;;  %v3792_v49 = vld [vmem:[%s5372_s14 + $0x18] sm:$0xff]  }
 0x555   : > { %3543 = vmatprep.subr.bf16.mxu0 %v4239_v59 }
 0x556   : > { %v3859_v51 = vpop.eup %3858 }
 0x557   : > { %v1595_v52 = vmul.f32 0.6931472, %v3859_v51  ;;  %v1968_v51 = vld [vmem:[#allocation13 + $0x60] sm:$0xff] }
 0x559   : > { %v1596_v24 = vadd.f32 %v1595_v52, %v5050_v37  ;;  %v1597_v57 = vadd.f32 %v1595_v52, %v5060_v19  ;;  %v1969_v52 = vld [vmem:[#allocation13 + $0x68] sm:$0xff] }
 0x55b   : > { %v1598_v58 = vmax.f32 %v1011_v53, %v1596_v24  ;;  %v1609_v61 = vmax.f32 %v1022_v55, %v1597_v57 }
 0x55d   : > { %v1599_v62 = vsub.f32 %v1011_v53, %v1598_v58  ;;  %v1602_v29 = vsub.f32 %v1596_v24, %v1598_v58  ;;  %v1610_v27 = vsub.f32 %v1022_v55, %v1609_v61  ;;  %v1613_v8 = vsub.f32 %v1597_v57, %v1609_v61  ;;  %v1970_v55 = vld [vmem:[#allocation13 + $0x70] sm:$0xff] }
 0x55e   : > { %v3544_v53 = vpack.c.bf16 %v1969_v52, %v1968_v51  ;;  %v3793_v51 = vld [vmem:[%s5372_s14 + $0x20] sm:$0xff]   ;;  %v3794_v52 = vld [vmem:[%s5372_s14 + $0x28] sm:$0xff]  }
 0x55f   : > { %v1600_v9 = vmul.f32 1.442695, %v1599_v62  ;;  %v1603_v10 = vmul.f32 1.442695, %v1602_v29  ;;  %v1611_v11 = vmul.f32 1.442695, %v1610_v27 }
 0x560   : > { %v1614_v12 = vmul.f32 1.442695, %v1613_v8  ;;  %3545 = vmatpush3.bf16.msra.mxu0 %v3544_v53  ;;  %v3795_v53 = vld [vmem:[%s5372_s14 + $0x30] sm:$0xff]  }
 0x561   : > { %3860 = vpow2.f32 %v1600_v9  ;;  %3371 = vmatprep.subr.mxu0 %v4237_v1 }
 0x562   : > { %3862 = vpow2.f32 %v1603_v10 }
 0x563   : > { %3864 = vpow2.f32 %v1611_v11  ;;  %v2052_v13 = vpop.f32.mrb[8].mxu0 }
 0x564   : > { %3866 = vpow2.f32 %v1614_v12  ;;  %v2053_v15 = vadd.f32 %v3075_v0, %v2052_v13  ;;  %v3341_v37 = vpop.f32.mrb[9].mxu0  ;;  %3372 = vmatpush3.msra.mxu0 %v1970_v55  ;;  %v3796_v55 = vld [vmem:[%s5372_s14 + $0x38] sm:$0xff]  }
 0x565   : > { %v2055_v16 = vpop.f32.mrb[10].mxu0  ;;  %3376 = vmatprep.subr.bf16.mxu0 %v4237_v1 }
 0x566   : > { %v2056_v19 = vadd.f32 %v3075_v0, %v2055_v16  ;;  %v3342_v17 = vpop.f32.mrb[11].mxu0  ;;  %v5100_v18 = vmul.f32 2.0, %v2053_v15 }
 0x568   : > { %v5102_v40 = vmul.f32 2.0, %v2056_v19  ;;  %v2077_v50 = vsub.f32 0.0, %v5100_v18  ;;  %v2062_v23 = vsel %vm2061_vm13, %v5100_v18, -inf }
 0x56a   : > { %v2066_v44 = vsel %vm2065_vm12, %v5102_v40, -inf  ;;  %v2078_v45 = vsub.f32 0.0, %v5102_v40  ;;  %v2079_v28 = vsel %vm2061_vm13, %v2077_v50, -inf }
 0x56b   : > { %v3861_v47 = vpop.eup %3860  ;;  %2067 = vmax.xlane.f32.xlu0 %v2066_v44 }
 0x56c   : > { %v3863_v54 = vpop.eup %3862  ;;  %v2082_v42 = vsel %vm2065_vm12, %v2078_v45, -inf }
 0x56d   : > { %v3865_v20 = vpop.eup %3864  ;;  %2083 = vmax.xlane.f32.xlu1 %v2082_v42  ;;  %v1605_v21 = vadd.f32 %v3863_v54, %v3861_v47 }
 0x56e   : > { %v3867_v22 = vpop.eup %3866 }
 0x56f   : > { %2063 = vmax.xlane.f32.xlu0 %v2062_v23  ;;  %3868 = vlog2.f32 %v1605_v21  ;;  %v1616_v25 = vadd.f32 %v3867_v22, %v3865_v20 }
 0x571   : > { %2080 = vmax.xlane.f32.xlu1 %v2079_v28  ;;  %3870 = vlog2.f32 %v1616_v25 }
 0x579   : > { %v3869_v30 = vpop.eup %3868 }
 0x57a   : > { %v1607_v31 = vmul.f32 0.6931472, %v3869_v30 }
 0x57b   : > { %v3871_v32 = vpop.eup %3870 }
 0x57c   : > { %v5116_v6 = vadd.f32 %v1607_v31, %v1598_v58  ;;  %v1618_v60 = vmul.f32 0.6931472, %v3871_v32 }
 0x57e   : > { %v5118_v5 = vadd.f32 %v1618_v60, %v1609_v61 }
 0x5f8   : > { %v2068_v24 = vpop.xlane.xlu0 %2067 }
 0x5f9   : > { %v2069_v58 = vsel %vm1520_vm8, %v2068_v24, -inf  ;;  %v3797_v24 = vld [vmem:[%s5372_s14 + $0x40] sm:$0xff]  }
 0x5fa   : > { %v2084_v57 = vpop.xlane.xlu1 %2083 }
 0x5fb   : > { %v2085_v29 = vsel %vm1520_vm8, %v2084_v57, -inf  ;;  %v3798_v57 = vld [vmem:[%s5372_s14 + $0x48] sm:$0xff]  }
 0x5fc   : > { %v2064_v61 = vpop.xlane.xlu0 %2063 }
 0x5fd   : > { %v2070_v62 = vmax.f32 %v2064_v61, %v2069_v58  ;;  %v3799_v58 = vld [vmem:[%s5372_s14 + $0x50] sm:$0xff]   ;;  %v2337_v61 = vshll.u32 %v5046_v56, 16 }
 0x5fe   : > { %v2081_v27 = vpop.xlane.xlu1 %2080 }
 0x5ff   : > { %v2071_v8 = vrot.slane %v2070_v62, 4  ;;  %v2086_v9 = vmax.f32 %v2081_v27, %v2085_v29  ;;  %v2339_v29 = vrot.slane %v2337_v61, 1  ;;  %v2335_v27 = vshrl.u32 %v5046_v56, 16 }
 0x601   : > { %v2072_v10 = vmax.f32 %v2070_v62, %v2071_v8  ;;  %v2087_v11 = vrot.slane %v2086_v9, 4  ;;  %v3800_v62 = vld [vmem:[%s5372_s14 + $0x58] sm:$0xff]   ;;  %v3801_v8 = vld [vmem:[%s5372_s14 + $0x60] sm:$0xff]  }
 0x603   : > { %v2073_v12 = vrot.slane %v2072_v10, 2  ;;  %v2088_v0 = vmax.f32 %v2086_v9, %v2087_v11  ;;  %v2340_v9 = vor.u32 %v2339_v29, %v2335_v27  ;;  %v3803_v11 = vld [vmem:[%s5372_s14 + $0x70] sm:$0xff]  }
 0x605   : > { %v2074_v13 = vmax.f32 %v2072_v10, %v2073_v12  ;;  %v2089_v15 = vrot.slane %v2088_v0, 2  ;;  %v3802_v10 = vld [vmem:[%s5372_s14 + $0x68] sm:$0xff]   ;;  %v3804_v12 = vld [vmem:[%s5372_s14 + $0x78] sm:$0xff]  }
 0x607   : > { %v2075_v37 = vrot.slane %v2074_v13, 1  ;;  %v2090_v16 = vmax.f32 %v2088_v0, %v2089_v15  ;;  %v3805_v0 = vld [vmem:[%s5372_s14 + $0x80] sm:$0xff]   ;;  %v2437_v15 = vrot.slane %v5046_v56, 1 }
 0x609   : > { %v5130_v19 = vmax.f32 %v2074_v13, %v2075_v37  ;;  %v2091_v17 = vrot.slane %v2090_v16, 1  ;;  %v3806_v13 = vld [vmem:[%s5372_s14 + $0x88] sm:$0xff]   ;;  %v3807_v37 = vld [vmem:[%s5374_s16] sm:$0xff]  }
 0x60a   : > { %3425 = vmatpush3.bf16.msra.mxu1 %v3807_v37  ;;  %v2536_v37 = vld [vmem:[#allocation14 + $0x18] sm:$0xff] }
 0x60b   : > { %v2093_v44 = vsub.f32 %v5100_v18, %v5130_v19  ;;  %v2094_v47 = vsub.f32 %v5102_v40, %v5130_v19  ;;  %v5136_v54 = vmax.f32 %v2090_v16, %v2091_v17  ;;  %v3808_v16 = vld [vmem:[%s5374_s16 + $0x8] sm:$0xff]   ;;  %3426 = vmatprep.subr.bf16.mxu1 %v4237_v1  ;;  %v3809_v17 = vld [vmem:[%s5374_s16 + $0x10] sm:$0xff]  }
 0x60d   : > { %v2095_v42 = vmul.f32 1.442695, %v2093_v44  ;;  %v2097_v20 = vmul.f32 1.442695, %v2094_v47  ;;  %v2099_v21 = vsub.f32 %v2077_v50, %v5136_v54  ;;  %v2100_v22 = vsub.f32 %v2078_v45, %v5136_v54  ;;  %v3811_v44 = vld [vmem:[%s5374_s16 + $0x20] sm:$0xff]  }
 0x60e   : > { %3427 = vmatpush3.bf16.msra.mxu1 %v3808_v16 }
 0x60f   : > { %3872 = vpow2.f32 %v2095_v42  ;;  %v2101_v23 = vmul.f32 1.442695, %v2099_v21  ;;  %v2103_v25 = vmul.f32 1.442695, %v2100_v22  ;;  %3428 = vmatprep.subr.bf16.mxu1 %v4237_v1 }
 0x610   : > { %3874 = vpow2.f32 %v2097_v20 }
 0x611   : > { %3876 = vpow2.f32 %v2101_v23 }
 0x612   : > { %3878 = vpow2.f32 %v2103_v25  ;;  %3429 = vmatpush3.bf16.msra.mxu1 %v3809_v17  ;;  %v2537_v17 = vld [vmem:[#allocation14 + $0x20] sm:$0xff] }
 0x613   : > { %3430 = vmatprep.subr.bf16.mxu1 %v4237_v1 }
 0x619   : > { %v3873_v28 = vpop.eup %3872 }
 0x61a   : > { %v3875_v30 = vpop.eup %3874  ;;  %v2105_v31 = vsel %vm2061_vm13, %v3873_v28, 0.0 }
 0x61b   : > { %v3877_v32 = vpop.eup %3876  ;;  %v2106_v60 = vsel %vm2065_vm12, %v3875_v30, 0.0 }
 0x61c   : > { %v3879_v2 = vpop.eup %3878  ;;  %v2107_v18 = vadd.f32 %v2106_v60, %v2105_v31  ;;  %v2114_v50 = vsel %vm2061_vm13, %v3877_v32, 0.0 }
 0x61d   : > { %v2115_v40 = vsel %vm2065_vm12, %v3879_v2, 0.0 }
 0x61e   : > { %v2108_v45 = vrot.slane %v2107_v18, 4  ;;  %v2116_v26 = vadd.f32 %v2115_v40, %v2114_v50 }
 0x620   : > { %v2109_v14 = vadd.f32 %v2108_v45, %v2107_v18  ;;  %v2117_v3 = vrot.slane %v2116_v26, 4 }
 0x622   : > { %v2110_v4 = vrot.slane %v2109_v14, 2  ;;  %v2118_v33 = vadd.f32 %v2117_v3, %v2116_v26 }
 0x624   : > { %v2111_v46 = vadd.f32 %v2110_v4, %v2109_v14  ;;  %v2119_v34 = vrot.slane %v2118_v33, 2 }
 0x626   : > { %v2112_v35 = vrot.slane %v2111_v46, 1  ;;  %v2120_v63 = vadd.f32 %v2119_v34, %v2118_v33 }
 0x628   : > { %v2121_v36 = vrot.slane %v2120_v63, 1  ;;  %v2113_v7 = vadd.f32 %v2112_v35, %v2111_v46  ;;  %v3084_v35 = vld [vmem:[%s5373_s15] ss:$0 sm:$0xff] }
 0x62a   : > { %v2122_v38 = vadd.f32 %v2121_v36, %v2120_v63 }
 0x62c   : > { %v2123_v41 = vsel %vm921_vm3, %v2113_v7, %v2122_v38 }
 0x62d   : > { %3374 = vmatmul.mubr.msk.f32.vlgmr.msra.gmra.mrb[6].mxu0 %vm2061_vm13, %v2123_v41 }
 0x62e   : > { %3377 = vmatpush3.bf16.msra.mxu0 %v3789_v39  ;;  %3388 = vmatprep.mubr.msk.bf16.mxu0 %vm4238_vm0, %v4237_v1 }
 0x62f   : > { %3378 = vmatprep.subr.bf16.mxu0 %v4237_v1 }
 0x632   : > { %3379 = vmatpush3.bf16.msra.mxu0 %v3790_v43 }
 0x633   : > { %3380 = vmatprep.subr.bf16.mxu0 %v4237_v1 }
 0x636   : > { %3381 = vmatpush3.bf16.msra.mxu0 %v3791_v48 }
 0x637   : > { %3382 = vmatprep.subr.bf16.mxu0 %v4237_v1 }
 0x63a   : > { %3383 = vmatpush3.bf16.msra.mxu0 %v3792_v49 }
 0x63b   : > { %3384 = vmatprep.subr.bf16.mxu0 %v4237_v1 }
 0x63e   : > { %3385 = vmatpush3.bf16.msra.mxu0 %v3793_v51  ;;  %v3130_v51 = vld [vmem:[%s5375_s17] ss:$0 sm:$0xff] }
 0x63f   : > { %3386 = vmatprep.subr.bf16.mxu0 %v4237_v1 }
 0x642   : > { %3387 = vmatpush3.bf16.msra.mxu0 %v3794_v52 }
 0x643   : > { %3392 = vmatprep.subr.bf16.mxu0 %v4237_v1 }
 0x645   : > { %3389 = vmatmul.mubr.msk.bf16.vlgmr.msra.gmra.mrb[12].mxu0 %vm2014_vm11, %v5046_v56  ;;  %v3810_v56 = vld [vmem:[%s5374_s16 + $0x18] sm:$0xff]  }
 0x646   : > { %3393 = vmatpush3.bf16.msra.mxu0 %v3795_v53  ;;  %3404 = vmatprep.mubr.msk.bf16.mxu0 %vm4238_vm0, %v4237_v1 }
 0x647   : > { %3394 = vmatprep.subr.bf16.mxu0 %v4237_v1  ;;  %3431 = vmatpush3.bf16.msra.mxu1 %v3810_v56  ;;  %v2538_v56 = vld [vmem:[#allocation14 + $0x28] sm:$0xff] }
 0x648   : > { %3432 = vmatprep.subr.bf16.mxu1 %v4237_v1 }
 0x64a   : > { %3395 = vmatpush3.bf16.msra.mxu0 %v3796_v55 }
 0x64b   : > { %3396 = vmatprep.subr.bf16.mxu0 %v4237_v1  ;;  %3433 = vmatpush3.bf16.msra.mxu1 %v3811_v44  ;;  %v3553_v44 = vpack.c.bf16 %v2538_v56, %v2537_v17 }
 0x64c   : > { %3546 = vmatprep.subr.bf16.mxu1 %v4239_v59 }
 0x64e   : > { %3397 = vmatpush3.bf16.msra.mxu0 %v3797_v24 }
 0x64f   : > { %3398 = vmatprep.subr.bf16.mxu0 %v4237_v1 }
 0x652   : > { %3399 = vmatpush3.bf16.msra.mxu0 %v3798_v57 }
 0x653   : > { %3400 = vmatprep.subr.bf16.mxu0 %v4237_v1 }
 0x656   : > { %3401 = vmatpush3.bf16.msra.mxu0 %v3799_v58 }
 0x657   : > { %3402 = vmatprep.subr.bf16.mxu0 %v4237_v1 }
 0x65a   : > { %3403 = vmatpush3.bf16.msra.mxu0 %v3800_v62 }
 0x65b   : > { %3408 = vmatprep.subr.bf16.mxu0 %v4237_v1 }
 0x65d   : > { %3405 = vmatmul.mubr.msk.bf16.vlgmr.msra.gmra.mrb[12].mxu0 %vm2014_vm11, %v2340_v9 }
 0x65e   : > { %3409 = vmatpush3.bf16.msra.mxu0 %v3801_v8  ;;  %3420 = vmatprep.mubr.msk.bf16.mxu0 %vm4238_vm0, %v4237_v1 }
 0x65f   : > { %3410 = vmatprep.subr.bf16.mxu0 %v4237_v1 }
 0x662   : > { %3411 = vmatpush3.bf16.msra.mxu0 %v3802_v10 }
 0x663   : > { %3412 = vmatprep.subr.bf16.mxu0 %v4237_v1 }
 0x666   : > { %3413 = vmatpush3.bf16.msra.mxu0 %v3803_v11 }
 0x667   : > { %3414 = vmatprep.subr.bf16.mxu0 %v4237_v1 }
 0x66a   : > { %3415 = vmatpush3.bf16.msra.mxu0 %v3804_v12  ;;  %v2533_v12 = vld [vmem:[#allocation14] sm:$0xff] }
 0x66b   : > { %3416 = vmatprep.subr.bf16.mxu0 %v4237_v1 }
 0x66e   : > { %3417 = vmatpush3.bf16.msra.mxu0 %v3805_v0  ;;  %v2534_v0 = vld [vmem:[#allocation14 + $0x8] sm:$0xff] }
 0x66f   : > { %3418 = vmatprep.subr.bf16.mxu0 %v4237_v1 }
 0x672   : > { %3419 = vmatpush3.bf16.msra.mxu0 %v3806_v13  ;;  %v2535_v13 = vld [vmem:[#allocation14 + $0x10] sm:$0xff] }
 0x673   : > { %v3550_v16 = vpack.c.bf16 %v2536_v37, %v2535_v13 }
 0x675   : > { %3421 = vmatmul.mubr.msk.bf16.vlgmr.msra.gmra.mrb[12].mxu0 %vm2014_vm11, %v2437_v15  ;;  %v3547_v15 = vpack.c.bf16 %v2534_v0, %v2533_v12 }
 0x700   : > { %v2193_v47 = vpop.f32.mrb[6].mxu0 }
 0x701   : > { %3880 = vlog2.f32 %v2193_v47  ;;  %v3375_v42 = vpop.f32.mrb[7].mxu0  ;;  %v2539_v47 = vld [vmem:[#allocation14 + $0x30] sm:$0xff] }
 0x702   : > { %v2540_v42 = vld [vmem:[#allocation14 + $0x38] sm:$0xff] }
 0x70b   : > { %v3881_v20 = vpop.eup %3880 }
 0x70c   : > { %v2198_v21 = vmul.f32 0.6931472, %v3881_v20  ;;  %v3556_v20 = vpack.c.bf16 %v2540_v42, %v2539_v47 }
 0x70e   : > { %v2199_v22 = vadd.f32 %v2198_v21, %v5130_v19  ;;  %v2200_v23 = vadd.f32 %v2198_v21, %v5136_v54  ;;  %v2541_v21 = vld [vmem:[#allocation14 + $0x40] sm:$0xff] }
 0x710   : > { %v2201_v25 = vmax.f32 %v5116_v6, %v2199_v22  ;;  %v2212_v28 = vmax.f32 %v5118_v5, %v2200_v23 }
 0x712   : > { %v2202_v30 = vsub.f32 %v5116_v6, %v2201_v25  ;;  %v2205_v31 = vsub.f32 %v2199_v22, %v2201_v25  ;;  %v2213_v32 = vsub.f32 %v5118_v5, %v2212_v28  ;;  %v2216_v60 = vsub.f32 %v2200_v23, %v2212_v28  ;;  %v2542_v22 = vld [vmem:[#allocation14 + $0x48] sm:$0xff] }
 0x713   : > { %v3559_v23 = vpack.c.bf16 %v2542_v22, %v2541_v21 }
 0x714   : > { %v2203_v2 = vmul.f32 1.442695, %v2202_v30  ;;  %v2206_v18 = vmul.f32 1.442695, %v2205_v31  ;;  %v2214_v50 = vmul.f32 1.442695, %v2213_v32 }
 0x715   : > { %v2217_v40 = vmul.f32 1.442695, %v2216_v60  ;;  %v2545_v31 = vld [vmem:[#allocation14 + $0x60] sm:$0xf] }
 0x716   : > { %3882 = vpow2.f32 %v2203_v2 }
 0x717   : > { %3884 = vpow2.f32 %v2206_v18 }
 0x718   : > { %3886 = vpow2.f32 %v2214_v50 }
 0x719   : > { %3888 = vpow2.f32 %v2217_v40 }
 0x720   : > { %v3883_v19 = vpop.eup %3882 }
 0x721   : > { %v3885_v54 = vpop.eup %3884 }
 0x722   : > { %v3887_v45 = vpop.eup %3886  ;;  %v2208_v26 = vadd.f32 %v3885_v54, %v3883_v19 }
 0x723   : > { %v3889_v14 = vpop.eup %3888 }
 0x724   : > { %3890 = vlog2.f32 %v2208_v26  ;;  %v2219_v3 = vadd.f32 %v3889_v14, %v3887_v45 }
 0x726   : > { %3892 = vlog2.f32 %v2219_v3 }
 0x72e   : > { %v3891_v6 = vpop.eup %3890 }
 0x72f   : > { %v2210_v4 = vmul.f32 0.6931472, %v3891_v6 }
 0x730   : > { %v3893_v5 = vpop.eup %3892 }
 0x731   : > { %v5260_v33 = vadd.f32 %v2210_v4, %v2201_v25  ;;  %v2221_v46 = vmul.f32 0.6931472, %v3893_v5  ;;  %v2543_v25 = vld [vmem:[#allocation14 + $0x50] sm:$0xff] }
 0x733   : > { %v5262_v34 = vadd.f32 %v2221_v46, %v2212_v28  ;;  %v2544_v28 = vld [vmem:[#allocation14 + $0x58] sm:$0xff] }
 0x734   : > { %v3562_v30 = vpack.c.bf16 %v2544_v28, %v2543_v25 }
 0x748   : > { %v2511_v63 = vpop.f32.mrb[12].mxu0 }
 0x749   : > { %v3568_v36 = vadd.f32 %v3084_v35, %v2511_v63  ;;  %v3422_v7 = vpop.f32.mrb[13].mxu0 }
 0x74a   : > { %v2514_v38 = vpop.f32.mrb[14].mxu0 }
 0x74b   : > { %v3569_v39 = vadd.f32 %v3084_v35, %v2514_v38  ;;  %v3423_v41 = vpop.f32.mrb[15].mxu0  ;;  %v2520_v43 = vmax.f32 %v3568_v36, 0.0 }
 0x74d   : > { %v2521_v48 = vmax.f32 %v3569_v39, 0.0 }
 0x74f   : > { %v2546_v49 = vpack.c.bf16 %v2521_v48, %v2520_v43 }
 0x751   : > { %3435 = vmatmul.mubr.msk.bf16.vlgmr.msra.gmra.mrb[16].mxu1 %vm2583_vm14, %v2546_v49 }
 0x752   : > { %3464 = vmatprep.mubr.msk.f32.mxu1 %vm4238_vm0, %v4237_v1  ;;  %vm2630_vm0 = vcmask 818176   ;;  %3548 = vmatpush3.bf16.msra.mxu1 %v3547_v15 }
 0x753   : > { %3549 = vmatprep.subr.bf16.mxu1 %v4239_v59 }
 0x756   : > { %3551 = vmatpush3.bf16.msra.mxu1 %v3550_v16 }
 0x757   : > { %3552 = vmatprep.subr.bf16.mxu1 %v4239_v59 }
 0x75a   : > { %3554 = vmatpush3.bf16.msra.mxu1 %v3553_v44 }
 0x75b   : > { %3555 = vmatprep.subr.bf16.mxu1 %v4239_v59 }
 0x75e   : > { %3557 = vmatpush3.bf16.msra.mxu1 %v3556_v20 }
 0x75f   : > { %3558 = vmatprep.subr.bf16.mxu1 %v4239_v59 }
 0x762   : > { %3560 = vmatpush3.bf16.msra.mxu1 %v3559_v23 }
 0x763   : > { %3561 = vmatprep.subr.bf16.mxu1 %v4239_v59 }
 0x766   : > { %3563 = vmatpush3.bf16.msra.mxu1 %v3562_v30 }
 0x767   : > { %3462 = vmatprep.subr.mxu1 %v4237_v1 }
 0x76a   : > { %3463 = vmatpush3.msk.msra.mxu1 %vm1520_vm8, %v2545_v31 }
 0x824   : > { %v2621_v52 = vpop.f32.mrb[16].mxu1 }
 0x825   : > { %v2622_v53 = vadd.f32 %v3130_v51, %v2621_v52  ;;  %v3436_v55 = vpop.f32.mrb[17].mxu1 }
 0x826   : > { %v2624_v24 = vpop.f32.mrb[18].mxu1 }
 0x827   : > { %v2625_v57 = vadd.f32 %v3130_v51, %v2624_v24  ;;  %v3437_v58 = vpop.f32.mrb[19].mxu1  ;;  %v5272_v61 = vmul.f32 2.0, %v2622_v53 }
 0x829   : > { %v5274_v62 = vmul.f32 2.0, %v2625_v57  ;;  %v2647_v9 = vsub.f32 0.0, %v5272_v61  ;;  %v2631_v10 = vsel %vm2630_vm0, %v5272_v61, -inf }
 0x82b   : > { %v2635_v29 = vsel %vm2634_vm15, %v5274_v62, -inf  ;;  %v2648_v27 = vsub.f32 0.0, %v5274_v62  ;;  %v2649_v11 = vsel %vm2630_vm0, %v2647_v9, -inf }
 0x82c   : > { %2636 = vmax.xlane.f32.xlu0 %v2635_v29 }
 0x82d   : > { %v2652_v8 = vsel %vm2634_vm15, %v2648_v27, -inf }
 0x82e   : > { %2653 = vmax.xlane.f32.xlu1 %v2652_v8 }
 0x830   : > { %2632 = vmax.xlane.f32.xlu0 %v2631_v10 }
 0x832   : > { %2650 = vmax.xlane.f32.xlu1 %v2649_v11 }
 0x8b9   : > { %v2637_v32 = vpop.xlane.xlu0 %2636 }
 0x8ba   : > { %v2639_v2 = vsel %vm2638_vm1, %v2637_v32, -inf }
 0x8bb   : > { %v2654_v60 = vpop.xlane.xlu1 %2653 }
 0x8bc   : > { %v2655_v40 = vsel %vm2638_vm1, %v2654_v60, -inf }
 0x8bd   : > { %v2633_v18 = vpop.xlane.xlu0 %2632 }
 0x8be   : > { %v2640_v50 = vmax.f32 %v2633_v18, %v2639_v2 }
 0x8bf   : > { %v2651_v19 = vpop.xlane.xlu1 %2650 }
 0x8c0   : > { %v2641_v54 = vrot.slane %v2640_v50, 4  ;;  %v2656_v45 = vmax.f32 %v2651_v19, %v2655_v40 }
 0x8c2   : > { %v2642_v26 = vmax.f32 %v2640_v50, %v2641_v54  ;;  %v2657_v14 = vrot.slane %v2656_v45, 4 }
 0x8c4   : > { %v2643_v3 = vrot.slane %v2642_v26, 2  ;;  %v2658_v59 = vmax.f32 %v2656_v45, %v2657_v14 }
 0x8c6   : > { %v2644_v6 = vmax.f32 %v2642_v26, %v2643_v3  ;;  %v2659_v4 = vrot.slane %v2658_v59, 2 }
 0x8c8   : > { %v2645_v1 = vrot.slane %v2644_v6, 1  ;;  %v2660_v5 = vmax.f32 %v2658_v59, %v2659_v4 }
 0x8ca   : > { %v2646_v46 = vmax.f32 %v2644_v6, %v2645_v1  ;;  %v2661_v35 = vrot.slane %v2660_v5, 1 }
 0x8cc   : > { %v2663_v63 = vsub.f32 %v5272_v61, %v2646_v46  ;;  %v2664_v36 = vsub.f32 %v5274_v62, %v2646_v46  ;;  %v2662_v7 = vmax.f32 %v2660_v5, %v2661_v35 }
 0x8ce   : > { %v2665_v38 = vmul.f32 1.442695, %v2663_v63  ;;  %v2667_v39 = vmul.f32 1.442695, %v2664_v36  ;;  %v2669_v41 = vsub.f32 %v2647_v9, %v2662_v7  ;;  %v2670_v43 = vsub.f32 %v2648_v27, %v2662_v7 }
 0x8d0   : > { %3894 = vpow2.f32 %v2665_v38  ;;  %v2671_v48 = vmul.f32 1.442695, %v2669_v41  ;;  %v2673_v49 = vmul.f32 1.442695, %v2670_v43 }
 0x8d1   : > { %3896 = vpow2.f32 %v2667_v39 }
 0x8d2   : > { %3898 = vpow2.f32 %v2671_v48 }
 0x8d3   : > { %3900 = vpow2.f32 %v2673_v49 }
 0x8da   : > { %v3895_v51 = vpop.eup %3894 }
 0x8db   : > { %v3897_v52 = vpop.eup %3896  ;;  %v2675_v53 = vsel %vm2630_vm0, %v3895_v51, 0.0 }
 0x8dc   : > { %v3899_v55 = vpop.eup %3898  ;;  %v2676_v24 = vsel %vm2634_vm15, %v3897_v52, 0.0 }
 0x8dd   : > { %v3901_v57 = vpop.eup %3900  ;;  %v2677_v58 = vadd.f32 %v2676_v24, %v2675_v53  ;;  %v2684_v61 = vsel %vm2630_vm0, %v3899_v55, 0.0 }
 0x8de   : > { %v2685_v62 = vsel %vm2634_vm15, %v3901_v57, 0.0 }
 0x8df   : > { %v2678_v29 = vrot.slane %v2677_v58, 4  ;;  %v2686_v27 = vadd.f32 %v2685_v62, %v2684_v61 }
 0x8e1   : > { %v2679_v8 = vadd.f32 %v2678_v29, %v2677_v58  ;;  %v2687_v9 = vrot.slane %v2686_v27, 4 }
 0x8e3   : > { %v2680_v10 = vrot.slane %v2679_v8, 2  ;;  %v2688_v11 = vadd.f32 %v2687_v9, %v2686_v27 }
 0x8e5   : > { %v2681_v12 = vadd.f32 %v2680_v10, %v2679_v8  ;;  %v2689_v0 = vrot.slane %v2688_v11, 2 }
 0x8e7   : > { %v2682_v13 = vrot.slane %v2681_v12, 1  ;;  %v2690_v15 = vadd.f32 %v2689_v0, %v2688_v11 }
 0x8e9   : > { %v2691_v37 = vrot.slane %v2690_v15, 1  ;;  %v2683_v16 = vadd.f32 %v2682_v13, %v2681_v12 }
 0x8eb   : > { %v2692_v17 = vadd.f32 %v2691_v37, %v2690_v15 }
 0x8ed   : > { %v2693_v56 = vsel %vm921_vm3, %v2683_v16, %v2692_v17 }
 0x8ee   : > { %3465 = vmatmul.mubr.msk.f32.vlgmr.msra.gmra.mrb[6].mxu1 %vm2630_vm0, %v2693_v56 }
 0x9c1   : > { %v2766_v44 = vpop.f32.mrb[6].mxu1 }
 0x9c2   : > { %3902 = vlog2.f32 %v2766_v44  ;;  %v3466_v47 = vpop.f32.mrb[7].mxu1 }
 0x9cc   : > { %v3903_v42 = vpop.eup %3902 }
 0x9cd   : > { %v2771_v20 = vmul.f32 0.6931472, %v3903_v42 }
 0x9cf   : > { %v2772_v21 = vadd.f32 %v2771_v20, %v2646_v46  ;;  %v2773_v22 = vadd.f32 %v2771_v20, %v2662_v7 }
 0x9d1   : > { %v2774_v23 = vmax.f32 %v5260_v33, %v2772_v21  ;;  %v2785_v25 = vmax.f32 %v5262_v34, %v2773_v22 }
 0x9d3   : > { %v2775_v28 = vsub.f32 %v5260_v33, %v2774_v23  ;;  %v2778_v30 = vsub.f32 %v2772_v21, %v2774_v23  ;;  %v2786_v31 = vsub.f32 %v5262_v34, %v2785_v25  ;;  %v2789_v32 = vsub.f32 %v2773_v22, %v2785_v25 }
 0x9d5   : > { %v2776_v60 = vmul.f32 1.442695, %v2775_v28  ;;  %v2779_v2 = vmul.f32 1.442695, %v2778_v30  ;;  %v2787_v18 = vmul.f32 1.442695, %v2786_v31 }
 0x9d6   : > { %v2790_v50 = vmul.f32 1.442695, %v2789_v32 }
 0x9d7   : > { %3904 = vpow2.f32 %v2776_v60 }
 0x9d8   : > { %3906 = vpow2.f32 %v2779_v2 }
 0x9d9   : > { %3908 = vpow2.f32 %v2787_v18 }
 0x9da   : > { %3910 = vpow2.f32 %v2790_v50 }
 0x9e1   : > { %v3905_v40 = vpop.eup %3904 }
 0x9e2   : > { %v3907_v19 = vpop.eup %3906 }
 0x9e3   : > { %v3909_v54 = vpop.eup %3908  ;;  %v2781_v45 = vadd.f32 %v3907_v19, %v3905_v40 }
 0x9e4   : > { %v3911_v26 = vpop.eup %3910 }
 0x9e5   : > { %3912 = vlog2.f32 %v2781_v45  ;;  %v2792_v33 = vadd.f32 %v3911_v26, %v3909_v54 }
 0x9e7   : > { %3914 = vlog2.f32 %v2792_v33 }
 0x9ef   : > { %v3913_v34 = vpop.eup %3912 }
 0x9f0   : > { %v2783_v14 = vmul.f32 0.6931472, %v3913_v34 }
 0x9f1   : > { %v3915_v3 = vpop.eup %3914 }
 0x9f2   : > { %v2784_v59 = vadd.f32 %v2783_v14, %v2774_v23  ;;  %v2794_v6 = vmul.f32 0.6931472, %v3915_v3 }
 0x9f4   : > { %v2795_v4 = vadd.f32 %v2794_v6, %v2785_v25 }
 0x9f6   : > { %v2797_v1 = vrot.slane %v2795_v4, 1 }
 0x9f8   : > { %v2799_v5 = vadd.f32 %v2797_v1, %v2784_v59 }
 0x9fa   : > { %v2800_v46 = vmul.f32 0.5, %v2799_v5 }
 0x9fc   : > { %2802 = vst.msk [vmem:[%s701_s30] sm:$0x1] %vm2801_vm2, %v2800_v46 }
 0x9fd   : > { %4153 = shalt.err (!%p4150_p9)
}
 0x9fe   : > { %s4154_s24 = scalar_lea.hbm %s5316_s20, 16  ;;  %s4158_s23 = scalar_lea.hbm %s5435_s7, 32 }
 0x9ff   : > { %p4155_p12 = scmp.ne.s32.totalorder %s5316_s20, %s4154_s24  ;;  %p4159_p3 = scmp.lt.u32.totalorder %s5316_s20, %s5435_s7 }
 0xa00   : > { %p4160_p4 = scmp.lt.u32.totalorder %s4158_s23, %s4154_s24  ;;  %p4162_p8 = scmp.lt.u32.totalorder %s4154_s24, %s5316_s20 }
 0xa01   : > { %p4156_p10 = pnand %p4155_p12, %p5436_p11 }
 0xa02   : > { %p4161_p7 = por %p4160_p4, %p4159_p3 }
 0xa03   : > { %p4157_p2 = pneg %p4156_p10 }
 0xa04   : > { %p4163_p13 = por %p4162_p8, %p4161_p7 }
 0xa06   : > { %p4164_p1 = pnand %p4163_p13, %p4157_p2 }
 0xa08   : > { %4167 = shalt.err (!%p4164_p1)
}
 0xa09   : > { %3626 = dma.vmem_to_hbm [thread:$0]  (%p5436_p11), %s5318_s25, 16, %s5316_s20, %s2804_s27  }
 0xa0a PF: > { %s5437_s26 = sld [smem:[#allocation26_spill]]  ;;  %s5438_s22 = sld [smem:[#allocation23_spill]] }
 0xa0b   : > { %s5439_s1 = sld [smem:[#allocation30_spill]] }
 0xa10   : > { %p3673_p0 = scmp.ge.s32.totalorder %s5437_s26, 2  ;;  %s2828_s3 = sand.u32 1, %s5438_s22  }
 0xa11   : > { %p5440_p6 = scmp.ne.s32.totalorder %s5439_s1, 0  ;;  %s2829_s5 = scalar_lea.sflag [#allocation4], %s2828_s3 }
 0xa13   : > { %p3654_p5 = pnand %p3673_p0, %p5440_p6 }
 0xa15   : > { %4205 = dma.done.wait (!%p3654_p5), %s2829_s5, 16  }
 0xa16   : > { %4207 = vsyncadd (!%p3654_p5), %s2829_s5, 4294967280  ;;  %s5441_s21 = sld [smem:[#allocation27_spill]]  ;;  %s5442_s0 = sld [smem:[#allocation24_spill]] }
 0xa17   : > { %s5443_s30 = sld [smem:[#allocation25_spill]]  ;;  %s5444_s20 = sld [smem:[#allocation28_spill]] }
 0xa1c   : > { %p34_p9 = scmp.ge.s32.totalorder %s5441_s21, 4  }
 0xa1e   :  { %36 = sbr.rel (!%p34_p9) target bundleno = 17 (0x11), region = 170 }
 0xa25   :  { %2833 = vsyncpa [#allocation3], 1 }
 0xa26   :  { %2835 = vsyncpa [#allocation3 + $0x1], 1 }
 0xa27   :  { %2836 = vsyncpa [#allocation6], 1 }
 0xa28   :  { %2837 = vsyncpa [#allocation9], 1 }
 0xa29   :  { %2838 = vsyncpa [#allocation12], 1 }
 0xa2a   :  { %2839 = vsyncpa [#allocation15], 1 }
 0xa2b   :  { %2840 = vsyncpa [#allocation4], 1 }
 0xa2c   :  { %2842 = vsyncpa [#allocation4 + $0x1], 1 }

</bundles_post_ra>
